<compile_context>
chip_gen: v5e
topology: v5e:2x2
jax: 0.10.0
libtpu: 0.0.40
codegen_flags: <defaults>
</compile_context>

<pallas_src>
import functools

import jax
import jax.numpy as jnp
from jax.experimental import pallas as pl
from jax.experimental.pallas import tpu as pltpu

EPS = 1e-5
_VMEM_LIMIT = 32 << 20      # 32 MiB scoped VMEM; safe on v5e/v6e/v7x, > 16 MiB v5e default
FUSED_MAX_ROWS = 1024       # whole-batch-in-VMEM fused path (conservative; ~<20 MiB live)
_TILE_M = 512               # batch-tile for the large-batch tiled path


def _round_up(n, m):
    return ((n + m - 1) // m) * m


# ---------------------------------------------------------------------------
# Fused small/medium-batch kernel (everything resident in VMEM, one launch)
# ---------------------------------------------------------------------------
def _fused_kernel(x_ref, w1_ref, w2_ref, w3_ref, w4_ref,
                  g1_ref, b1_ref, g2_ref, b2_ref, g3_ref, b3_ref, g4_ref, b4_ref,
                  wh_ref, bh_ref, out_ref, *, batch):
    inv_b = 1.0 / float(batch)

    def lin_bn_relu(h_bf16, w_ref, g_ref, b_ref):
        y = jnp.dot(h_bf16, w_ref[...], preferred_element_type=jnp.float32)
        mean = jnp.sum(y, axis=0, keepdims=True) * inv_b
        var = jnp.maximum(jnp.sum(y * y, axis=0, keepdims=True) * inv_b - mean * mean, 0.0)
        scale = g_ref[...] * jax.lax.rsqrt(var + EPS)      # EUP rsqrt
        shift = b_ref[...] - mean * scale
        return jnp.maximum(y * scale + shift, 0.0)

    h = x_ref[...].astype(jnp.bfloat16)                    # bf16 MXU operand
    h = lin_bn_relu(h, w1_ref, g1_ref, b1_ref).astype(jnp.bfloat16)
    h = lin_bn_relu(h, w2_ref, g2_ref, b2_ref).astype(jnp.bfloat16)
    h = lin_bn_relu(h, w3_ref, g3_ref, b3_ref).astype(jnp.bfloat16)
    h = lin_bn_relu(h, w4_ref, g4_ref, b4_ref)             # (B, 128) f32 (zero-padded cols)
    # 1-wide head as a VPU multiply + lane reduction (padded wh rows are zero).
    out_ref[...] = jnp.sum(h * wh_ref[...], axis=-1, keepdims=True) + bh_ref[...]


def _fused_forward(x, prep):
    b = x.shape[0]
    kern = functools.partial(_fused_kernel, batch=b)
    out = pl.pallas_call(
        kern,
        out_shape=jax.ShapeDtypeStruct((b, 1), jnp.float32),
        compiler_params=pltpu.CompilerParams(vmem_limit_bytes=_VMEM_LIMIT),
    )(x,
      prep["w"][0], prep["w"][1], prep["w"][2], prep["w"][3],
      prep["gamma"][0], prep["beta"][0], prep["gamma"][1], prep["beta"][1],
      prep["gamma"][2], prep["beta"][2], prep["gamma"][3], prep["beta"][3],
      prep["head_w"], prep["head_b"])
    return out[:, 0]


# ---------------------------------------------------------------------------
# Tiled large-batch kernels
# ---------------------------------------------------------------------------
def _linear_stats_kernel(x_ref, w_ref, y_ref, s1_ref, s2_ref):
    """First Linear (bias dropped; cancelled by train-mode BN) + per-tile stat partials."""
    y = jnp.dot(x_ref[...].astype(jnp.bfloat16), w_ref[...],
                preferred_element_type=jnp.float32)
    y_ref[...] = y.astype(jnp.bfloat16)                    # bf16 intermediate to HBM
    # Stats from the f32 MXU result (exact); padded batch rows are zero -> no effect.
    s1_ref[...] = jnp.sum(y, axis=0, keepdims=True).reshape(s1_ref.shape)
    s2_ref[...] = jnp.sum(y * y, axis=0, keepdims=True).reshape(s2_ref.shape)


def _bn_relu_linear_stats_kernel(y_prev_ref, s1p_ref, s2p_ref, g_ref, be_ref, w_ref,
                                 y_ref, s1_ref, s2_ref, *, batch, tile_m, padded):
    """Fused BN(prev-layer whole-batch stats) + ReLU + next Linear + stat partials."""
    inv_b = 1.0 / float(batch)
    mean = s1p_ref[...] * inv_b
    var = jnp.maximum(s2p_ref[...] * inv_b - mean * mean, 0.0)   # clamp vs f32 rounding
    scale = g_ref[...] * jax.lax.rsqrt(var + EPS)
    shift = be_ref[...] - mean * scale
    h = jnp.maximum(y_prev_ref[...].astype(jnp.float32) * scale + shift, 0.0)
    if padded:
        # Zero padded rows so the next layer's batch statistics stay exact.
        row = pl.program_id(0) * tile_m + jax.lax.broadcasted_iota(jnp.int32, h.shape, 0)
        h = jnp.where(row < batch, h, 0.0)
    y = jnp.dot(h.astype(jnp.bfloat16), w_ref[...], preferred_element_type=jnp.float32)
    y_ref[...] = y.astype(jnp.bfloat16)
    s1_ref[...] = jnp.sum(y, axis=0, keepdims=True).reshape(s1_ref.shape)
    s2_ref[...] = jnp.sum(y * y, axis=0, keepdims=True).reshape(s2_ref.shape)


def _bn_relu_head_kernel(y_prev_ref, s1p_ref, s2p_ref, g_ref, be_ref, wh_ref, bh_ref,
                         out_ref, *, batch):
    """Fused BN + ReLU + 1-wide head Linear as a VPU multiply + lane reduction."""
    inv_b = 1.0 / float(batch)
    mean = s1p_ref[...] * inv_b
    var = jnp.maximum(s2p_ref[...] * inv_b - mean * mean, 0.0)
    scale = g_ref[...] * jax.lax.rsqrt(var + EPS)
    shift = be_ref[...] - mean * scale
    h = jnp.maximum(y_prev_ref[...].astype(jnp.float32) * scale + shift, 0.0)
    out_ref[...] = jnp.sum(h * wh_ref[...], axis=-1, keepdims=True) + bh_ref[...]


# ---------------------------------------------------------------------------
# pallas_call wrappers (tiled path)
# ---------------------------------------------------------------------------
def _const_spec(shape):
    # Whole array as a single block, constant index -> VMEM-resident across steps.
    return pl.BlockSpec(shape, lambda i: tuple(0 for _ in shape))


def _row_tiled_spec(tile_m, width):
    return pl.BlockSpec((tile_m, width), lambda i: (i, 0))


def _stats_spec(dout):
    # Per-tile partial stats: one (1, 1, dout) block per grid step (lane-dense).
    return pl.BlockSpec((1, 1, dout), lambda i: (i, 0, 0))


def _linear_stats_call(xk, w_bf16, tile_m, n_tiles):
    bp, din = xk.shape
    dout = w_bf16.shape[1]
    y, s1t, s2t = pl.pallas_call(
        _linear_stats_kernel,
        grid=(n_tiles,),
        in_specs=[_row_tiled_spec(tile_m, din), _const_spec(w_bf16.shape)],
        out_specs=[_row_tiled_spec(tile_m, dout), _stats_spec(dout), _stats_spec(dout)],
        out_shape=[jax.ShapeDtypeStruct((bp, dout), jnp.bfloat16),
                   jax.ShapeDtypeStruct((n_tiles, 1, dout), jnp.float32),
                   jax.ShapeDtypeStruct((n_tiles, 1, dout), jnp.float32)],
        compiler_params=pltpu.CompilerParams(
            dimension_semantics=("parallel",),             # per-tile partials -> parallel
            vmem_limit_bytes=_VMEM_LIMIT),
    )(xk, w_bf16)
    return y, jnp.sum(s1t, axis=0), jnp.sum(s2t, axis=0)   # tree-reduce partials -> (1, dout)


def _bn_linear_stats_call(y_prev, s1p, s2p, g, be, w_bf16, batch, tile_m, n_tiles, padded):
    bp, dprev = y_prev.shape
    dout = w_bf16.shape[1]
    kern = functools.partial(_bn_relu_linear_stats_kernel,
                             batch=batch, tile_m=tile_m, padded=padded)
    y, s1t, s2t = pl.pallas_call(
        kern,
        grid=(n_tiles,),
        in_specs=[_row_tiled_spec(tile_m, dprev),
                  _const_spec((1, dprev)), _const_spec((1, dprev)),
                  _const_spec((1, dprev)), _const_spec((1, dprev)),
                  _const_spec(w_bf16.shape)],
        out_specs=[_row_tiled_spec(tile_m, dout), _stats_spec(dout), _stats_spec(dout)],
        out_shape=[jax.ShapeDtypeStruct((bp, dout), jnp.bfloat16),
                   jax.ShapeDtypeStruct((n_tiles, 1, dout), jnp.float32),
                   jax.ShapeDtypeStruct((n_tiles, 1, dout), jnp.float32)],
        compiler_params=pltpu.CompilerParams(
            dimension_semantics=("parallel",),
            vmem_limit_bytes=_VMEM_LIMIT),
    )(y_prev, s1p, s2p, g, be, w_bf16)
    return y, jnp.sum(s1t, axis=0), jnp.sum(s2t, axis=0)


def _bn_relu_head_call(y_prev, s1p, s2p, g, be, wh_row, bh, batch, tile_m, n_tiles):
    bp, dprev = y_prev.shape
    kern = functools.partial(_bn_relu_head_kernel, batch=batch)
    return pl.pallas_call(
        kern,
        grid=(n_tiles,),
        in_specs=[_row_tiled_spec(tile_m, dprev),
                  _const_spec((1, dprev)), _const_spec((1, dprev)),
                  _const_spec((1, dprev)), _const_spec((1, dprev)),
                  _const_spec((1, dprev)), _const_spec((1, 1))],
        out_specs=pl.BlockSpec((tile_m, 1), lambda i: (i, 0)),
        out_shape=jax.ShapeDtypeStruct((bp, 1), jnp.float32),
        compiler_params=pltpu.CompilerParams(
            dimension_semantics=("parallel",),
            vmem_limit_bytes=_VMEM_LIMIT),
    )(y_prev, s1p, s2p, g, be, wh_row, bh)


def _tiled_forward(x, prep):
    b = x.shape[0]
    tm = _TILE_M
    bp = _round_up(b, tm)
    nt = bp // tm
    padded = bp != b
    if padded:
        # Single pad+cast pass; zero pad rows + dropped biases keep stats exact.
        xk = jnp.pad(x, ((0, bp - b), (0, 0))).astype(jnp.bfloat16)
    else:
        xk = x   # f32 straight from HBM; cast to bf16 inside the kernel (no wrapper pass)

    y, s1, s2 = _linear_stats_call(xk, prep["w"][0], tm, nt)
    for l in range(1, 4):
        y, s1, s2 = _bn_linear_stats_call(
            y, s1, s2, prep["gamma"][l - 1], prep["beta"][l - 1], prep["w"][l],
            b, tm, nt, padded)
    out = _bn_relu_head_call(y, s1, s2, prep["gamma"][3], prep["beta"][3],
                             prep["head_w"], prep["head_b"], b, tm, nt)
    return out[:b, 0]                                      # PyTorch: self.head(x).squeeze()


# ---------------------------------------------------------------------------
# Forward dispatch
# ---------------------------------------------------------------------------
def concept_net2_forward(x, prep):
    """x: [B, 2*embed_dims] float32.  Returns [B] float32."""
    if x.shape[0] <= FUSED_MAX_ROWS:
        return _fused_forward(x, prep)
    return _tiled_forward(x, prep)


# ---------------------------------------------------------------------------
# Parameters
# ---------------------------------------------------------------------------
def init_params(key, embed_dims):
    """Mirror the module's parameter shapes.  Linear weights stored pre-transposed [in, out].

    PyTorch inits BN gamma=1 / beta=0; we randomize them slightly so the affine path is
    numerically exercised (forward semantics are parameter-generic).  Pre-BN Linear
    biases exist (module fidelity) but are unused by the kernels: train-mode BN
    cancels them exactly.
    """
    input_dim = embed_dims * 2
    dims = [input_dim, 512, 256, 128, 64]
    blocks = []
    for i in range(4):
        fan_in, fan_out = dims[i], dims[i + 1]
        key, kw, kb, kg, kbe = jax.random.split(key, 5)
        bound = 1.0 / jnp.sqrt(fan_in)
        blocks.append({
            "w": jax.random.uniform(kw, (fan_in, fan_out), jnp.float32, -bound, bound),
            "b": jax.random.uniform(kb, (1, fan_out), jnp.float32, -bound, bound),
            "gamma": jax.random.uniform(kg, (1, fan_out), jnp.float32, 0.5, 1.5),
            "beta": jax.random.uniform(kbe, (1, fan_out), jnp.float32, -0.5, 0.5),
        })
    key, kw, kb = jax.random.split(key, 3)
    bound = 1.0 / jnp.sqrt(64)
    head_w = jax.random.uniform(kw, (64, 1), jnp.float32, -bound, bound)
    head_b = jax.random.uniform(kb, (1, 1), jnp.float32, -bound, bound)
    return {"blocks": blocks, "head_w": head_w, "head_b": head_b}


def prepare_params(params):
    """One-time kernel-ready prep: bf16 weights, zero-pad the 64-wide layer / head to
    128 lanes (exact), reshape BN params.  Done outside the forward (no per-call casts)."""
    ws, gs, bs = [], [], []
    for blk in params["blocks"]:
        w, g, be = blk["w"], blk["gamma"], blk["beta"]
        fan_out = w.shape[1]
        pad = _round_up(fan_out, 128) - fan_out
        if pad:
            w = jnp.pad(w, ((0, 0), (0, pad)))
            g = jnp.pad(g, ((0, 0), (0, pad)))
            be = jnp.pad(be, ((0, 0), (0, pad)))
        ws.append(w.astype(jnp.bfloat16))
        gs.append(g.astype(jnp.float32))
        bs.append(be.astype(jnp.float32))
    w4_out = ws[-1].shape[1]
    head_w = params["head_w"]
    pad_rows = w4_out - head_w.shape[0]
    if pad_rows:
        head_w = jnp.pad(head_w, ((0, pad_rows), (0, 0)))
    head_w = head_w.reshape(1, w4_out).astype(jnp.float32)
    return {"w": ws, "gamma": gs, "beta": bs,
            "head_w": head_w, "head_b": params["head_b"].astype(jnp.float32)}


# ---------------------------------------------------------------------------
# References
# ---------------------------------------------------------------------------
def reference_forward_f32(x, params):
    """Exact PyTorch-semantics reference in f32 (WITH the Linear biases BN cancels)."""
    h = x
    for blk in params["blocks"]:
        y = h @ blk["w"] + blk["b"]
        mean = jnp.mean(y, axis=0, keepdims=True)
        var = jnp.mean((y - mean) ** 2, axis=0, keepdims=True)
        h = jnp.maximum(blk["gamma"] * (y - mean) / jnp.sqrt(var + EPS) + blk["beta"], 0.0)
    return jnp.squeeze(h @ params["head_w"] + params["head_b"], axis=-1)


def reference_forward_kernel_math(x, params):
    """Pure-JAX mirror of the fused kernel's math (bf16 matmul operands, f32 accumulate,
    bias dropped, fused scale/shift, single-pass clamped variance)."""
    b = x.shape[0]
    h = x
    for blk in params["blocks"]:
        y = jnp.dot(h.astype(jnp.bfloat16), blk["w"].astype(jnp.bfloat16),
                    preferred_element_type=jnp.float32)
        mean = jnp.sum(y, axis=0, keepdims=True) / b
        var = jnp.maximum(jnp.sum(y * y, axis=0, keepdims=True) / b - mean * mean, 0.0)
        scale = blk["gamma"] * jax.lax.rsqrt(var + EPS)
        shift = blk["beta"] - mean * scale
        h = jnp.maximum(y * scale + shift, 0.0)
    return jnp.sum(h * params["head_w"].reshape(1, -1), axis=-1) + params["head_b"][0, 0]


if __name__ == "__main__":
    embed_dims = 32     # small synthetic embed size; hidden widths 512..64 fixed by the module
    batch = 8           # BatchNorm1d (train mode) needs B > 1; 8 = one sublane group
    key = jax.random.PRNGKey(0)
    key, kx, kp = jax.random.split(key, 3)

    x = jax.random.normal(kx, (batch, embed_dims * 2), jnp.float32)
    params = init_params(kp, embed_dims)
    prep = prepare_params(params)

    fwd = jax.jit(concept_net2_forward)

    # --- fused (single-launch) path at the small test shape ---
    out = jax.block_until_ready(fwd(x, prep))
    assert out.shape == (batch,), out.shape

    # Tight check against a pure-JAX mirror of the exact kernel math.
    ref_same = reference_forward_kernel_math(x, params)
    assert jnp.allclose(out, ref_same, atol=2e-3, rtol=2e-3), (out, ref_same)

    # Loose check against the full-f32 PyTorch-semantics reference (bf16 MXU operands
    # introduce small, expected differences; cancelled biases ARE included here).
    ref_f32 = reference_forward_f32(x, params)
    assert jnp.allclose(out, ref_f32, atol=0.15, rtol=0.05), (out, ref_f32)

    # --- tiled large-batch path (per-tile partial stats, bf16 intermediates, padding) ---
    big_b = FUSED_MAX_ROWS + 19          # forces tiling and a ragged last tile
    key, kxb = jax.random.split(key)
    xb = jax.random.normal(kxb, (big_b, embed_dims * 2), jnp.float32)
    out_b = jax.block_until_ready(fwd(xb, prep))
    assert out_b.shape == (big_b,), out_b.shape
    ref_b = reference_forward_f32(xb, params)
    assert jnp.allclose(out_b, ref_b, atol=0.25, rtol=0.1), (
        float(jnp.max(jnp.abs(out_b - ref_b))))

    print("KERNEL_OK")
</pallas_src>

<mosaic_0001>
module attributes {stable_mosaic.version = 11 : i64} {
  func.func @_fused_kernel(%arg0: memref<8x64xf32, #tpu.memory_space<vmem>>, %arg1: memref<64x512xbf16, #tpu.memory_space<vmem>>, %arg2: memref<512x256xbf16, #tpu.memory_space<vmem>>, %arg3: memref<256x128xbf16, #tpu.memory_space<vmem>>, %arg4: memref<128x128xbf16, #tpu.memory_space<vmem>>, %arg5: memref<1x512xf32, #tpu.memory_space<vmem>>, %arg6: memref<1x512xf32, #tpu.memory_space<vmem>>, %arg7: memref<1x256xf32, #tpu.memory_space<vmem>>, %arg8: memref<1x256xf32, #tpu.memory_space<vmem>>, %arg9: memref<1x128xf32, #tpu.memory_space<vmem>>, %arg10: memref<1x128xf32, #tpu.memory_space<vmem>>, %arg11: memref<1x128xf32, #tpu.memory_space<vmem>>, %arg12: memref<1x128xf32, #tpu.memory_space<vmem>>, %arg13: memref<1x128xf32, #tpu.memory_space<vmem>>, %arg14: memref<1x1xf32, #tpu.memory_space<vmem>>, %arg15: memref<8x1xf32, #tpu.memory_space<vmem>>) attributes {dimension_semantics = [], scalar_prefetch = 0 : i64, scratch_operands = 0 : i64, tpu.core_type = #tpu.core_type<tc>} {
    %c0 = arith.constant 0 : index
    %c0_0 = arith.constant 0 : index
    %0 = vector.load %arg0[%c0, %c0_0] : memref<8x64xf32, #tpu.memory_space<vmem>>, vector<8x64xf32>
    %1 = arith.truncf %0 : vector<8x64xf32> to vector<8x64xbf16>
    %c0_1 = arith.constant 0 : index
    %c0_2 = arith.constant 0 : index
    %2 = vector.load %arg1[%c0_1, %c0_2] : memref<64x512xbf16, #tpu.memory_space<vmem>>, vector<64x512xbf16>
    %cst = arith.constant dense<0.000000e+00> : vector<8x512xf32>
    %3 = tpu.matmul %1, %2, %cst {dimension_numbers = #tpu.dot_dimension_numbers<[1], [0], [0], [1], [0, 0, 1, 1], [], []>} : vector<8x64xbf16>, vector<64x512xbf16>, vector<8x512xf32> -> vector<8x512xf32>
    %cst_3 = arith.constant dense<0.000000e+00> : vector<512xf32>
    %4 = vector.multi_reduction <add>, %3, %cst_3 [0] : vector<8x512xf32> to vector<512xf32>
    %5 = vector.shape_cast %4 : vector<512xf32> to vector<1x512xf32>
    %cst_4 = arith.constant 1.250000e-01 : f32
    %6 = vector.broadcast %cst_4 : f32 to vector<1x512xf32>
    %7 = arith.mulf %5, %6 : vector<1x512xf32>
    %8 = arith.mulf %3, %3 : vector<8x512xf32>
    %cst_5 = arith.constant dense<0.000000e+00> : vector<512xf32>
    %9 = vector.multi_reduction <add>, %8, %cst_5 [0] : vector<8x512xf32> to vector<512xf32>
    %10 = vector.shape_cast %9 : vector<512xf32> to vector<1x512xf32>
    %cst_6 = arith.constant 1.250000e-01 : f32
    %11 = vector.broadcast %cst_6 : f32 to vector<1x512xf32>
    %12 = arith.mulf %10, %11 : vector<1x512xf32>
    %13 = arith.mulf %7, %7 : vector<1x512xf32>
    %14 = arith.subf %12, %13 : vector<1x512xf32>
    %cst_7 = arith.constant 0.000000e+00 : f32
    %15 = vector.broadcast %cst_7 : f32 to vector<1x512xf32>
    %16 = arith.maximumf %14, %15 : vector<1x512xf32>
    %c0_8 = arith.constant 0 : index
    %c0_9 = arith.constant 0 : index
    %17 = vector.load %arg5[%c0_8, %c0_9] : memref<1x512xf32, #tpu.memory_space<vmem>>, vector<1x512xf32>
    %cst_10 = arith.constant 9.99999974E-6 : f32
    %18 = vector.broadcast %cst_10 : f32 to vector<1x512xf32>
    %19 = arith.addf %16, %18 : vector<1x512xf32>
    %20 = math.rsqrt %19 : vector<1x512xf32>
    %21 = arith.mulf %17, %20 : vector<1x512xf32>
    %c0_11 = arith.constant 0 : index
    %c0_12 = arith.constant 0 : index
    %22 = vector.load %arg6[%c0_11, %c0_12] : memref<1x512xf32, #tpu.memory_space<vmem>>, vector<1x512xf32>
    %23 = arith.mulf %7, %21 : vector<1x512xf32>
    %24 = arith.subf %22, %23 : vector<1x512xf32>
    %25 = vector.broadcast %21 : vector<1x512xf32> to vector<8x512xf32>
    %26 = arith.mulf %3, %25 : vector<8x512xf32>
    %27 = vector.broadcast %24 : vector<1x512xf32> to vector<8x512xf32>
    %28 = arith.addf %26, %27 : vector<8x512xf32>
    %cst_13 = arith.constant 0.000000e+00 : f32
    %29 = vector.broadcast %cst_13 : f32 to vector<8x512xf32>
    %30 = arith.maximumf %28, %29 : vector<8x512xf32>
    %31 = arith.truncf %30 : vector<8x512xf32> to vector<8x512xbf16>
    %c0_14 = arith.constant 0 : index
    %c0_15 = arith.constant 0 : index
    %32 = vector.load %arg2[%c0_14, %c0_15] : memref<512x256xbf16, #tpu.memory_space<vmem>>, vector<512x256xbf16>
    %cst_16 = arith.constant dense<0.000000e+00> : vector<8x256xf32>
    %33 = tpu.matmul %31, %32, %cst_16 {dimension_numbers = #tpu.dot_dimension_numbers<[1], [0], [0], [1], [0, 0, 1, 1], [], []>} : vector<8x512xbf16>, vector<512x256xbf16>, vector<8x256xf32> -> vector<8x256xf32>
    %cst_17 = arith.constant dense<0.000000e+00> : vector<256xf32>
    %34 = vector.multi_reduction <add>, %33, %cst_17 [0] : vector<8x256xf32> to vector<256xf32>
    %35 = vector.shape_cast %34 : vector<256xf32> to vector<1x256xf32>
    %cst_18 = arith.constant 1.250000e-01 : f32
    %36 = vector.broadcast %cst_18 : f32 to vector<1x256xf32>
    %37 = arith.mulf %35, %36 : vector<1x256xf32>
    %38 = arith.mulf %33, %33 : vector<8x256xf32>
    %cst_19 = arith.constant dense<0.000000e+00> : vector<256xf32>
    %39 = vector.multi_reduction <add>, %38, %cst_19 [0] : vector<8x256xf32> to vector<256xf32>
    %40 = vector.shape_cast %39 : vector<256xf32> to vector<1x256xf32>
    %cst_20 = arith.constant 1.250000e-01 : f32
    %41 = vector.broadcast %cst_20 : f32 to vector<1x256xf32>
    %42 = arith.mulf %40, %41 : vector<1x256xf32>
    %43 = arith.mulf %37, %37 : vector<1x256xf32>
    %44 = arith.subf %42, %43 : vector<1x256xf32>
    %cst_21 = arith.constant 0.000000e+00 : f32
    %45 = vector.broadcast %cst_21 : f32 to vector<1x256xf32>
    %46 = arith.maximumf %44, %45 : vector<1x256xf32>
    %c0_22 = arith.constant 0 : index
    %c0_23 = arith.constant 0 : index
    %47 = vector.load %arg7[%c0_22, %c0_23] : memref<1x256xf32, #tpu.memory_space<vmem>>, vector<1x256xf32>
    %cst_24 = arith.constant 9.99999974E-6 : f32
    %48 = vector.broadcast %cst_24 : f32 to vector<1x256xf32>
    %49 = arith.addf %46, %48 : vector<1x256xf32>
    %50 = math.rsqrt %49 : vector<1x256xf32>
    %51 = arith.mulf %47, %50 : vector<1x256xf32>
    %c0_25 = arith.constant 0 : index
    %c0_26 = arith.constant 0 : index
    %52 = vector.load %arg8[%c0_25, %c0_26] : memref<1x256xf32, #tpu.memory_space<vmem>>, vector<1x256xf32>
    %53 = arith.mulf %37, %51 : vector<1x256xf32>
    %54 = arith.subf %52, %53 : vector<1x256xf32>
    %55 = vector.broadcast %51 : vector<1x256xf32> to vector<8x256xf32>
    %56 = arith.mulf %33, %55 : vector<8x256xf32>
    %57 = vector.broadcast %54 : vector<1x256xf32> to vector<8x256xf32>
    %58 = arith.addf %56, %57 : vector<8x256xf32>
    %cst_27 = arith.constant 0.000000e+00 : f32
    %59 = vector.broadcast %cst_27 : f32 to vector<8x256xf32>
    %60 = arith.maximumf %58, %59 : vector<8x256xf32>
    %61 = arith.truncf %60 : vector<8x256xf32> to vector<8x256xbf16>
    %c0_28 = arith.constant 0 : index
    %c0_29 = arith.constant 0 : index
    %62 = vector.load %arg3[%c0_28, %c0_29] : memref<256x128xbf16, #tpu.memory_space<vmem>>, vector<256x128xbf16>
    %cst_30 = arith.constant dense<0.000000e+00> : vector<8x128xf32>
    %63 = tpu.matmul %61, %62, %cst_30 {dimension_numbers = #tpu.dot_dimension_numbers<[1], [0], [0], [1], [0, 0, 1, 1], [], []>} : vector<8x256xbf16>, vector<256x128xbf16>, vector<8x128xf32> -> vector<8x128xf32>
    %cst_31 = arith.constant dense<0.000000e+00> : vector<128xf32>
    %64 = vector.multi_reduction <add>, %63, %cst_31 [0] : vector<8x128xf32> to vector<128xf32>
    %65 = vector.shape_cast %64 : vector<128xf32> to vector<1x128xf32>
    %cst_32 = arith.constant 1.250000e-01 : f32
    %66 = vector.broadcast %cst_32 : f32 to vector<1x128xf32>
    %67 = arith.mulf %65, %66 : vector<1x128xf32>
    %68 = arith.mulf %63, %63 : vector<8x128xf32>
    %cst_33 = arith.constant dense<0.000000e+00> : vector<128xf32>
    %69 = vector.multi_reduction <add>, %68, %cst_33 [0] : vector<8x128xf32> to vector<128xf32>
    %70 = vector.shape_cast %69 : vector<128xf32> to vector<1x128xf32>
    %cst_34 = arith.constant 1.250000e-01 : f32
    %71 = vector.broadcast %cst_34 : f32 to vector<1x128xf32>
    %72 = arith.mulf %70, %71 : vector<1x128xf32>
    %73 = arith.mulf %67, %67 : vector<1x128xf32>
    %74 = arith.subf %72, %73 : vector<1x128xf32>
    %cst_35 = arith.constant 0.000000e+00 : f32
    %75 = vector.broadcast %cst_35 : f32 to vector<1x128xf32>
    %76 = arith.maximumf %74, %75 : vector<1x128xf32>
    %c0_36 = arith.constant 0 : index
    %c0_37 = arith.constant 0 : index
    %77 = vector.load %arg9[%c0_36, %c0_37] : memref<1x128xf32, #tpu.memory_space<vmem>>, vector<1x128xf32>
    %cst_38 = arith.constant 9.99999974E-6 : f32
    %78 = vector.broadcast %cst_38 : f32 to vector<1x128xf32>
    %79 = arith.addf %76, %78 : vector<1x128xf32>
    %80 = math.rsqrt %79 : vector<1x128xf32>
    %81 = arith.mulf %77, %80 : vector<1x128xf32>
    %c0_39 = arith.constant 0 : index
    %c0_40 = arith.constant 0 : index
    %82 = vector.load %arg10[%c0_39, %c0_40] : memref<1x128xf32, #tpu.memory_space<vmem>>, vector<1x128xf32>
    %83 = arith.mulf %67, %81 : vector<1x128xf32>
    %84 = arith.subf %82, %83 : vector<1x128xf32>
    %85 = vector.broadcast %81 : vector<1x128xf32> to vector<8x128xf32>
    %86 = arith.mulf %63, %85 : vector<8x128xf32>
    %87 = vector.broadcast %84 : vector<1x128xf32> to vector<8x128xf32>
    %88 = arith.addf %86, %87 : vector<8x128xf32>
    %cst_41 = arith.constant 0.000000e+00 : f32
    %89 = vector.broadcast %cst_41 : f32 to vector<8x128xf32>
    %90 = arith.maximumf %88, %89 : vector<8x128xf32>
    %91 = arith.truncf %90 : vector<8x128xf32> to vector<8x128xbf16>
    %c0_42 = arith.constant 0 : index
    %c0_43 = arith.constant 0 : index
    %92 = vector.load %arg4[%c0_42, %c0_43] : memref<128x128xbf16, #tpu.memory_space<vmem>>, vector<128x128xbf16>
    %cst_44 = arith.constant dense<0.000000e+00> : vector<8x128xf32>
    %93 = tpu.matmul %91, %92, %cst_44 {dimension_numbers = #tpu.dot_dimension_numbers<[1], [0], [0], [1], [0, 0, 1, 1], [], []>} : vector<8x128xbf16>, vector<128x128xbf16>, vector<8x128xf32> -> vector<8x128xf32>
    %cst_45 = arith.constant dense<0.000000e+00> : vector<128xf32>
    %94 = vector.multi_reduction <add>, %93, %cst_45 [0] : vector<8x128xf32> to vector<128xf32>
    %95 = vector.shape_cast %94 : vector<128xf32> to vector<1x128xf32>
    %cst_46 = arith.constant 1.250000e-01 : f32
    %96 = vector.broadcast %cst_46 : f32 to vector<1x128xf32>
    %97 = arith.mulf %95, %96 : vector<1x128xf32>
    %98 = arith.mulf %93, %93 : vector<8x128xf32>
    %cst_47 = arith.constant dense<0.000000e+00> : vector<128xf32>
    %99 = vector.multi_reduction <add>, %98, %cst_47 [0] : vector<8x128xf32> to vector<128xf32>
    %100 = vector.shape_cast %99 : vector<128xf32> to vector<1x128xf32>
    %cst_48 = arith.constant 1.250000e-01 : f32
    %101 = vector.broadcast %cst_48 : f32 to vector<1x128xf32>
    %102 = arith.mulf %100, %101 : vector<1x128xf32>
    %103 = arith.mulf %97, %97 : vector<1x128xf32>
    %104 = arith.subf %102, %103 : vector<1x128xf32>
    %cst_49 = arith.constant 0.000000e+00 : f32
    %105 = vector.broadcast %cst_49 : f32 to vector<1x128xf32>
    %106 = arith.maximumf %104, %105 : vector<1x128xf32>
    %c0_50 = arith.constant 0 : index
    %c0_51 = arith.constant 0 : index
    %107 = vector.load %arg11[%c0_50, %c0_51] : memref<1x128xf32, #tpu.memory_space<vmem>>, vector<1x128xf32>
    %cst_52 = arith.constant 9.99999974E-6 : f32
    %108 = vector.broadcast %cst_52 : f32 to vector<1x128xf32>
    %109 = arith.addf %106, %108 : vector<1x128xf32>
    %110 = math.rsqrt %109 : vector<1x128xf32>
    %111 = arith.mulf %107, %110 : vector<1x128xf32>
    %c0_53 = arith.constant 0 : index
    %c0_54 = arith.constant 0 : index
    %112 = vector.load %arg12[%c0_53, %c0_54] : memref<1x128xf32, #tpu.memory_space<vmem>>, vector<1x128xf32>
    %113 = arith.mulf %97, %111 : vector<1x128xf32>
    %114 = arith.subf %112, %113 : vector<1x128xf32>
    %115 = vector.broadcast %111 : vector<1x128xf32> to vector<8x128xf32>
    %116 = arith.mulf %93, %115 : vector<8x128xf32>
    %117 = vector.broadcast %114 : vector<1x128xf32> to vector<8x128xf32>
    %118 = arith.addf %116, %117 : vector<8x128xf32>
    %cst_55 = arith.constant 0.000000e+00 : f32
    %119 = vector.broadcast %cst_55 : f32 to vector<8x128xf32>
    %120 = arith.maximumf %118, %119 : vector<8x128xf32>
    %c0_56 = arith.constant 0 : index
    %c0_57 = arith.constant 0 : index
    %121 = vector.load %arg13[%c0_56, %c0_57] : memref<1x128xf32, #tpu.memory_space<vmem>>, vector<1x128xf32>
    %122 = vector.broadcast %121 : vector<1x128xf32> to vector<8x128xf32>
    %123 = arith.mulf %120, %122 : vector<8x128xf32>
    %cst_58 = arith.constant dense<0.000000e+00> : vector<8xf32>
    %124 = vector.multi_reduction <add>, %123, %cst_58 [1] : vector<8x128xf32> to vector<8xf32>
    %125 = vector.shape_cast %124 : vector<8xf32> to vector<8x1xf32>
    %c0_59 = arith.constant 0 : index
    %c0_60 = arith.constant 0 : index
    %126 = vector.load %arg14[%c0_59, %c0_60] : memref<1x1xf32, #tpu.memory_space<vmem>>, vector<1x1xf32>
    %127 = vector.broadcast %126 : vector<1x1xf32> to vector<8x1xf32>
    %128 = arith.addf %125, %127 : vector<8x1xf32>
    %c0_61 = arith.constant 0 : index
    %c0_62 = arith.constant 0 : index
    %129 = vector.load %arg15[%c0_61, %c0_62] : memref<8x1xf32, #tpu.memory_space<vmem>>, vector<8x1xf32>
    tpu.vector_store %arg15[%c0_61, %c0_62], %128 {strides = array<i32>} : memref<8x1xf32, #tpu.memory_space<vmem>>, vector<8x1xf32>,
    return
  }
}

</mosaic_0001>

<bundles_post_ra>
// kernel: concept_net2_forward.1
= control target key start
LH: loop header
LB: loop body
LE: loop exit
PB: predicated region body
PF: predicated region fallthrough
CT: control target
= control target key end

     0   :  { %s2545_s0 = inlined_call_operand.hbm [shape: f32[8,64], index: 0, kind: input, shape index: {}]   ;;  %s2546_s1 = inlined_call_operand.hbm [shape: bf16[64,512], index: 1, kind: input, shape index: {}]   ;;  %s2547_s2 = inlined_call_operand.hbm [shape: bf16[512,256], index: 2, kind: input, shape index: {}]   ;;  %s2548_s3 = inlined_call_operand.hbm [shape: bf16[256,128], index: 3, kind: input, shape index: {}]   ;;  %s2549_s4 = inlined_call_operand.hbm [shape: bf16[128,128], index: 4, kind: input, shape index: {}]   ;;  %s2550_s5 = inlined_call_operand.vmem [shape: f32[1,512], index: 5, kind: input, shape index: {}]   ;;  %s2551_s6 = inlined_call_operand.hbm [shape: f32[1,512], index: 6, kind: input, shape index: {}]   ;;  %s2552_s7 = inlined_call_operand.vmem [shape: f32[1,256], index: 7, kind: input, shape index: {}]   ;;  %s2553_s8 = inlined_call_operand.hbm [shape: f32[1,256], index: 8, kind: input, shape index: {}]   ;;  %s2554_s9 = inlined_call_operand.vmem [shape: f32[1,128], index: 9, kind: input, shape index: {}]   ;;  %s2555_s10 = inlined_call_operand.hbm [shape: f32[1,128], index: 10, kind: input, shape index: {}]   ;;  %s2556_s11 = inlined_call_operand.vmem [shape: f32[1,128], index: 11, kind: input, shape index: {}]   ;;  %s2557_s12 = inlined_call_operand.hbm [shape: f32[1,128], index: 12, kind: input, shape index: {}]   ;;  %s2558_s13 = inlined_call_operand.vmem [shape: f32[1,128], index: 13, kind: input, shape index: {}]   ;;  %s2559_s14 = inlined_call_operand.<no memory space> [shape: f32[1,1], index: 14, kind: input, shape index: {}]   ;;  %s2560_s15 = inlined_call_operand.vmem [shape: f32[8,1], index: 15, kind: output, shape index: {}]  }
   0x1   :  { %v20_v0 = vstv %s2559_s14 }
   0x2   :  { %21 = vst [vmem:[#allocation2] sm:$0x1] %v20_v0 }
   0x3   :  { %22 = vsyncpa [#allocation4], 0 }
   0x4   :  { %23 = vsyncpa [#allocation6], 0 }
   0x5   :  { %24 = vsyncpa [#allocation9], 0 }
   0x6   :  { %25 = vsyncpa [#allocation12], 0  ;;  %s42_s22 = sshll.u32 %s2546_s1, 4  ;;  %s43_s22 = int_to_ptr.hbm [resolvable:$true] %s42_s22 }
   0x7   :  { %26 = vsyncpa [#allocation15], 0  ;;  %s2224_s23 = smov [#allocation5]   ;;  %s68_s27 = sshll.u32 %s2548_s3, 4  ;;  %s69_s27 = int_to_ptr.hbm [resolvable:$true] %s68_s27 }
   0x8   :  { %s44_s24 = sshll.u32 %s2224_s23, 4  ;;  %s2225_s28 = smov 256   ;;  %s45_s24 = int_to_ptr.vmem [resolvable:$true] %s44_s24 }
   0x9   :  { %s2226_s14 = smov 16   ;;  %s2227_s29 = smov [#allocation8]  }
   0xa   :  { %50 = dma.hbm_to_vmem [thread:$0]  %s43_s22, 2048, %s45_s24, [#allocation6], %s2225_s28, %s2225_s28, %s2226_s14  }
   0xb   :  { %s70_s30 = sshll.u32 %s2227_s29, 4  ;;  %s2228_s16 = smov 64   ;;  %s71_s30 = int_to_ptr.vmem [resolvable:$true] %s70_s30 }
   0xc   :  { %s2229_s17 = smov 4   ;;  %s97_s19 = sshll.u32 %s2551_s6, 4  ;;  %s98_s19 = int_to_ptr.hbm [resolvable:$true] %s97_s19 }
   0xd   :  { %76 = dma.hbm_to_vmem [thread:$0]  %s69_s27, 2048, %s71_s30, [#allocation9], %s2228_s16, %s2228_s16, %s2229_s17  }
   0xe   :  { %s2230_s20 = smov [#allocation11]   ;;  %s123_s23 = sshll.u32 %s2555_s10, 4  ;;  %s124_s23 = int_to_ptr.hbm [resolvable:$true] %s123_s23 }
   0xf   :  { %s99_s3 = sshll.u32 %s2230_s20, 4  ;;  %s2231_s24 = smov [#allocation14]   ;;  %s100_s3 = int_to_ptr.vmem [resolvable:$true] %s99_s3 }
  0x10   :  { %102 = dma.hbm_to_vmem [thread:$0]  %s98_s19, 64, %s100_s3, [#allocation12]  }
  0x11   :  { %s125_s25 = sshll.u32 %s2231_s24, 4  ;;  %s32_s27 = sshll.u32 %s2545_s0, 4  ;;  %s126_s25 = int_to_ptr.vmem [resolvable:$true] %s125_s25  ;;  %s33_s27 = int_to_ptr.hbm [resolvable:$true] %s32_s27 }
  0x12   :  { %128 = dma.hbm_to_vmem [thread:$0]  %s124_s23, 16, %s126_s25, [#allocation15]  }
  0x13   :  { %s55_s29 = sshll.u32 %s2547_s2, 4  ;;  %s2232_s30 = smov [#allocation3]   ;;  %s56_s29 = int_to_ptr.hbm [resolvable:$true] %s55_s29 }
  0x14   :  { %s34_s1 = sshll.u32 %s2232_s30, 4  ;;  %s2233_s10 = smov [#allocation7]   ;;  %s35_s1 = int_to_ptr.vmem [resolvable:$true] %s34_s1 }
  0x15   :  { %37 = dma.hbm_to_vmem [thread:$0]  %s33_s27, 128, %s35_s1, [#allocation4]  }
  0x16   :  { %s57_s18 = sshll.u32 %s2233_s10, 4  ;;  %s2234_s19 = smov 128   ;;  %s58_s18 = int_to_ptr.vmem [resolvable:$true] %s57_s18 }
  0x17   :  { %s2235_s20 = smov 8   ;;  %s81_s21 = sshll.u32 %s2549_s4, 4  ;;  %s82_s21 = int_to_ptr.hbm [resolvable:$true] %s81_s21 }
  0x18   :  { %63 = dma.hbm_to_vmem [thread:$0]  %s56_s29, 8192, %s58_s18, [#allocation6], %s2234_s19, %s2234_s19, %s2235_s20  }
  0x19   :  { %s2236_s22 = smov [#allocation10]   ;;  %s110_s25 = sshll.u32 %s2553_s8, 4  ;;  %s111_s25 = int_to_ptr.hbm [resolvable:$true] %s110_s25 }
  0x1a   :  { %s83_s23 = sshll.u32 %s2236_s22, 4  ;;  %s2237_s26 = smov [#allocation13]   ;;  %s84_s23 = int_to_ptr.vmem [resolvable:$true] %s83_s23 }
  0x1b   :  { %89 = dma.hbm_to_vmem [thread:$0]  %s82_s21, 1024, %s84_s23, [#allocation9], %s2228_s16, %s2228_s16, %s2229_s17  }
  0x1c   :  { %s112_s28 = sshll.u32 %s2237_s26, 4  ;;  %s136_s14 = sshll.u32 %s2557_s12, 4  ;;  %s113_s28 = int_to_ptr.vmem [resolvable:$true] %s112_s28  ;;  %s137_s14 = int_to_ptr.hbm [resolvable:$true] %s136_s14 }
  0x1d   :  { %115 = dma.hbm_to_vmem [thread:$0]  %s111_s25, 32, %s113_s28, [#allocation12]  }
  0x1e   :  { %s2238_s4 = smov [#allocation16]  }
  0x1f   :  { %s138_s29 = sshll.u32 %s2238_s4, 4  ;;  %s139_s29 = int_to_ptr.vmem [resolvable:$true] %s138_s29 }
  0x20   :  { %141 = dma.hbm_to_vmem [thread:$0]  %s137_s14, 16, %s139_s29, [#allocation15]  }
  0x21   :  { %2214 = dma.done.wait [#allocation4], 128  }
  0x22   :  { %2215 = vsyncadd [#allocation4], 4294967168 }
  0x23   :  { %2216 = dma.done.wait [#allocation6], 10240  }
  0x24   :  { %2217 = vsyncadd [#allocation6], 4294957056 }
  0x25   :  { %2218 = dma.done.wait [#allocation9], 3072  }
  0x26   :  { %2219 = vsyncadd [#allocation9], 4294964224 }
  0x27   :  { %2220 = dma.done.wait [#allocation12], 96  }
  0x28   :  { %2221 = vsyncadd [#allocation12], 4294967200 }
  0x29   :  { %2222 = dma.done.wait [#allocation15], 32  }
  0x2a   :  { %2223 = vsyncadd [#allocation15], 4294967264  ;;  %v1491_v1 = vld [vmem:[#allocation5 + $0x60] sm:$0xf]  ;;  %v1875_v2 = vld [vmem:[#allocation5 + $0x6c] sm:$0xf0] }
  0x2b   :  { %v1499_v3 = vld [vmem:[#allocation5 + $0x68] sm:$0xf]  ;;  %v1492_v4 = vor.u32 %v1875_v2, %v1491_v1  ;;  %v1876_v5 = vld [vmem:[#allocation5 + $0x74] sm:$0xf0]  ;;  %v1873_v6 = vld [vmem:[#allocation5 + $0x64] sm:$0xf] }
  0x2c   :  { %v1493_v7 = vld [vmem:[#allocation5 + $0x70] sm:$0xf0]  ;;  %v1500_v8 = vor.u32 %v1876_v5, %v1499_v3  ;;  %v1475_v10 = vld [vmem:[#allocation5 + $0x40] sm:$0xf]  ;;  %v1871_v11 = vld [vmem:[#allocation5 + $0x4c] sm:$0xf0] }
  0x2d   :  { %v1496_v9 = vor.u32 %v1873_v6, %v1493_v7  ;;  %v1483_v12 = vld [vmem:[#allocation5 + $0x48] sm:$0xf]  ;;  %289 = vmatpush.bf16.msra.mxu3 %v1492_v4  ;;  %v1476_v13 = vor.u32 %v1871_v11, %v1475_v10  ;;  %v1872_v14 = vld [vmem:[#allocation5 + $0x54] sm:$0xf0]  ;;  %v1869_v15 = vld [vmem:[#allocation5 + $0x44] sm:$0xf] }
  0x2e   :  { %v1477_v16 = vld [vmem:[#allocation5 + $0x50] sm:$0xf0]  ;;  %315 = vmatpush.bf16.msra.mxu2 %v1500_v8  ;;  %v1484_v17 = vor.u32 %v1872_v14, %v1483_v12  ;;  %v1459_v19 = vld [vmem:[#allocation5 + $0x20] sm:$0xf]  ;;  %v1867_v20 = vld [vmem:[#allocation5 + $0x2c] sm:$0xf0] }
  0x2f   :  { %302 = vmatpush.bf16.msra.mxu1 %v1496_v9  ;;  %v1480_v18 = vor.u32 %v1869_v15, %v1477_v16  ;;  %v1467_v21 = vld [vmem:[#allocation5 + $0x28] sm:$0xf]  ;;  %v1868_v22 = vld [vmem:[#allocation5 + $0x34] sm:$0xf0]  ;;  %v1865_v23 = vld [vmem:[#allocation5 + $0x24] sm:$0xf]  ;;  %v1460_v25 = vor.u32 %v1867_v20, %v1459_v19 }
  0x30   :  { %v1461_v24 = vld [vmem:[#allocation5 + $0x30] sm:$0xf0]  ;;  %v1468_v26 = vor.u32 %v1868_v22, %v1467_v21  ;;  %v1443_v28 = vld [vmem:[#allocation5] sm:$0xf]  ;;  %v1863_v29 = vld [vmem:[#allocation5 + $0xc] sm:$0xf0] }
  0x31   :  { %290 = vmatpush.bf16.msra.mxu3 %v1476_v13  ;;  %v1464_v27 = vor.u32 %v1865_v23, %v1461_v24  ;;  %v1451_v30 = vld [vmem:[#allocation5 + $0x8] sm:$0xf]  ;;  %v1864_v31 = vld [vmem:[#allocation5 + $0x14] sm:$0xf0]  ;;  %v1861_v32 = vld [vmem:[#allocation5 + $0x4] sm:$0xf]  ;;  %v1444_v36 = vor.u32 %v1863_v29, %v1443_v28 }
  0x32   :  { %316 = vmatpush.bf16.msra.mxu2 %v1484_v17  ;;  %v1445_v33 = vld [vmem:[#allocation5 + $0x10] sm:$0xf0]  ;;  %v1874_v34 = vld [vmem:[#allocation5 + $0x6c] sm:$0xf]  ;;  %v1501_v35 = vld [vmem:[#allocation5 + $0x78] sm:$0xf0]  ;;  %v1452_v38 = vor.u32 %v1864_v31, %v1451_v30 }
  0x33   :  { %303 = vmatpush.bf16.msra.mxu1 %v1480_v18  ;;  %v183_v37 = vld [vmem:[#allocation3] sm:$0xff]  ;;  %v1448_v39 = vor.u32 %v1861_v32, %v1445_v33  ;;  %v1504_v40 = vor.u32 %v1874_v34, %v1501_v35  ;;  %v1870_v42 = vld [vmem:[#allocation5 + $0x4c] sm:$0xf]  ;;  %vm281_vm0 = vcmask 523264   ;;  %v1567_v5 = vld [vmem:[#allocation7 + $0x70] sm:$0xf] }
  0x34   :  { %v184_v41 = vpack.c.bf16 %v183_v37, %v183_v37  ;;  %v1485_v43 = vld [vmem:[#allocation5 + $0x58] sm:$0xf0]  ;;  %v1866_v45 = vld [vmem:[#allocation5 + $0x2c] sm:$0xf]  ;;  %v1892_v6 = vld [vmem:[#allocation7 + $0x74] sm:$0xf0] }
  0x35   :  { %291 = vmatpush.bf16.msra.mxu3 %v1460_v25  ;;  %v1488_v44 = vor.u32 %v1870_v42, %v1485_v43  ;;  %v1469_v46 = vld [vmem:[#allocation5 + $0x38] sm:$0xf0]  ;;  %v1862_v48 = vld [vmem:[#allocation5 + $0xc] sm:$0xf]  ;;  %v1631_v11 = vld [vmem:[#allocation7 + $0xf0] sm:$0xf]  ;;  %v1568_v15 = vor.u32 %v1892_v6, %v1567_v5 }
  0x36   :  { %317 = vmatpush.bf16.msra.mxu2 %v1468_v26  ;;  %v1472_v47 = vor.u32 %v1866_v45, %v1469_v46  ;;  %v1453_v49 = vld [vmem:[#allocation5 + $0x18] sm:$0xf0]  ;;  %v1908_v12 = vld [vmem:[#allocation7 + $0xf4] sm:$0xf0]  ;;  %v1695_v17 = vld [vmem:[#allocation7 + $0x170] sm:$0xf] }
  0x37   :  { %304 = vmatpush.bf16.msra.mxu1 %v1464_v27  ;;  %v1456_v50 = vor.u32 %v1862_v48, %v1453_v49  ;;  %v1632_v16 = vor.u32 %v1908_v12, %v1631_v11  ;;  %v1924_v18 = vld [vmem:[#allocation7 + $0x174] sm:$0xf0]  ;;  %v1759_v23 = vld [vmem:[#allocation7 + $0x1f0] sm:$0xf]  ;;  %904 = vmatpush.bf16.msra.mxu0 %v1568_v15  ;;  %v1559_v29 = vld [vmem:[#allocation7 + $0x60] sm:$0xf] }
  0x38   :  { %v1940_v24 = vld [vmem:[#allocation7 + $0x1f4] sm:$0xf0]  ;;  %v1696_v27 = vor.u32 %v1924_v18, %v1695_v17  ;;  %v1890_v30 = vld [vmem:[#allocation7 + $0x64] sm:$0xf0]  ;;  %v1687_v42 = vld [vmem:[#allocation7 + $0x160] sm:$0xf] }
  0x39   :  { %292 = vmatpush.bf16.msra.mxu3 %v1444_v36  ;;  %v1760_v28 = vor.u32 %v1940_v24, %v1759_v23  ;;  %v1623_v36 = vld [vmem:[#allocation7 + $0xe0] sm:$0xf]  ;;  %v1906_v37 = vld [vmem:[#allocation7 + $0xe4] sm:$0xf0]  ;;  %vm461_vm9 = vcmask 1040384   ;;  %vm463_vm10 = vcmask 1042434  }
  0x3a   :  { %318 = vmatpush.bf16.msra.mxu2 %v1452_v38  ;;  %v1922_v43 = vld [vmem:[#allocation7 + $0x164] sm:$0xf0]  ;;  %v1751_v48 = vld [vmem:[#allocation7 + $0x1e0] sm:$0xf]  ;;  %vm465_vm12 = vcmask 1041408  }
  0x3b   :  { %305 = vmatpush.bf16.msra.mxu1 %v1448_v39  ;;  %v1543_v15 = vld [vmem:[#allocation7 + $0x40] sm:$0xf] }
  0x3c   :  { %1505 = vmatmul.msk.bf16.vlgmr.msra.gmra.mxu3 %vm281_vm0, %v184_v41 }
  0x3d   :  { %328 = vmatpush.bf16.msrb.mxu3 %v1504_v40  ;;  %1507 = vmatmul.msk.bf16.vlgmr.msra.gmra.mxu2 %vm281_vm0, %v184_v41 }
  0x3e   :  { %1506 = vmatmul.msk.bf16.vlgmr.msra.gmra.mxu1 %vm281_vm0, %v184_v41  ;;  %930 = vmatpush.bf16.msrb.mxu2 %v1696_v27  ;;  %v1902_v27 = vld [vmem:[#allocation7 + $0xc4] sm:$0xf0] }
  0x3f   :  { %917 = vmatpush.bf16.msrb.mxu1 %v1632_v16 }
  0x41   :  { %329 = vmatpush.bf16.msrb.mxu3 %v1488_v44 }
  0x45   :  { %330 = vmatpush.bf16.msrb.mxu3 %v1472_v47 }
  0x49   :  { %331 = vmatpush.bf16.msrb.mxu3 %v1456_v50 }
  0x4c   :  { %1508 = vmatmul.msk.bf16.vlgmr.msrb.gmra.mxu3 %vm281_vm0, %v184_v41  ;;  %v1560_v41 = vor.u32 %v1890_v30, %v1559_v29  ;;  %v1671_v30 = vld [vmem:[#allocation7 + $0x140] sm:$0xf] }
  0x4d   :  { %943 = vmatpush.bf16.msra.mxu3 %v1760_v28 }
  0x4e   :  { %905 = vmatpush.bf16.msra.mxu0 %v1560_v41 }
  0xbb   :  { %v2359_v51 = vpop.f32.mrf.mxu1 }
  0xbc   :  { %v343_v52 = vrot.slane %v2359_v51, 4  ;;  %v366_v53 = vmul.f32 %v2359_v51, %v2359_v51 }
  0xbe   :  { %v344_v54 = vadd.f32 %v343_v52, %v2359_v51  ;;  %v375_v55 = vrot.slane %v366_v53, 4  ;;  %v1624_v52 = vor.u32 %v1906_v37, %v1623_v36 }
  0xbf   :  { %v2365_v58 = vpop.f32.mrf.mxu3 }
  0xc0   :  { %v345_v56 = vrot.slane %v344_v54, 2  ;;  %v376_v57 = vadd.f32 %v375_v55, %v366_v53  ;;  %v337_v59 = vrot.slane %v2365_v58, 4  ;;  %v365_v60 = vmul.f32 %v2365_v58, %v2365_v58  ;;  %v2370_v61 = vpop.f32.mrf.mxu2  ;;  %v1551_v55 = vld [vmem:[#allocation7 + $0x50] sm:$0xf]  ;;  %918 = vmatpush.bf16.msrb.mxu1 %v1624_v52 }
  0xc1   :  { %v349_v0 = vrot.slane %v2370_v61, 4  ;;  %v367_v1 = vmul.f32 %v2370_v61, %v2370_v61  ;;  %v1688_v53 = vor.u32 %v1922_v43, %v1687_v42  ;;  %v1884_v42 = vld [vmem:[#allocation7 + $0x34] sm:$0xf0]  ;;  %v1599_v43 = vld [vmem:[#allocation7 + $0xb0] sm:$0xf] }
  0xc2   :  { %v346_v62 = vadd.f32 %v345_v56, %v344_v54  ;;  %v377_v63 = vrot.slane %v376_v57, 2  ;;  %v338_v2 = vadd.f32 %v337_v59, %v2365_v58  ;;  %v369_v3 = vrot.slane %v365_v60, 4  ;;  %v1938_v54 = vld [vmem:[#allocation7 + $0x1e4] sm:$0xf0]  ;;  %v1663_v52 = vld [vmem:[#allocation7 + $0x130] sm:$0xf] }
  0xc3   :  { %v309_v4 = vpop.f32.mrf.mxu1  ;;  %v350_v9 = vadd.f32 %v349_v0, %v2370_v61  ;;  %v381_v10 = vrot.slane %v367_v1, 4  ;;  %931 = vmatpush.bf16.msrb.mxu2 %v1688_v53  ;;  %v1916_v53 = vld [vmem:[#allocation7 + $0x134] sm:$0xf0] }
  0xc4   :  { %v347_v7 = vrot.slane %v346_v62, 1  ;;  %v378_v8 = vadd.f32 %v377_v63, %v376_v57  ;;  %v339_v13 = vrot.slane %v338_v2, 2  ;;  %v370_v14 = vadd.f32 %v369_v3, %v365_v60  ;;  %v1615_v63 = vld [vmem:[#allocation7 + $0xd0] sm:$0xf]  ;;  %v1904_v3 = vld [vmem:[#allocation7 + $0xd4] sm:$0xf0] }
  0xc5   :  { %v351_v21 = vrot.slane %v350_v9, 2  ;;  %v382_v22 = vadd.f32 %v381_v10, %v367_v1  ;;  %v1752_v60 = vor.u32 %v1938_v54, %v1751_v48  ;;  %v1679_v4 = vld [vmem:[#allocation7 + $0x150] sm:$0xf]  ;;  %v1900_v48 = vld [vmem:[#allocation7 + $0xb4] sm:$0xf0] }
  0xc6   :  { %v348_v19 = vadd.f32 %v347_v7, %v346_v62  ;;  %v379_v20 = vrot.slane %v378_v8, 1  ;;  %v340_v25 = vadd.f32 %v339_v13, %v338_v2  ;;  %v371_v26 = vrot.slane %v370_v14, 2  ;;  %v1888_v62 = vld [vmem:[#allocation7 + $0x54] sm:$0xf0]  ;;  %v1743_v10 = vld [vmem:[#allocation7 + $0x1d0] sm:$0xf] }
  0xc7   :  { %v352_v33 = vadd.f32 %v351_v21, %v350_v9  ;;  %v383_v34 = vrot.slane %v382_v22, 2  ;;  %v296_v35 = vpop.f32.mrf.mxu3  ;;  %v1552_v2 = vor.u32 %v1888_v62, %v1551_v55  ;;  %944 = vmatpush.bf16.msra.mxu3 %v1752_v60  ;;  %v1920_v9 = vld [vmem:[#allocation7 + $0x154] sm:$0xf0]  ;;  %v1886_v21 = vld [vmem:[#allocation7 + $0x44] sm:$0xf0]  ;;  %v1664_v62 = vor.u32 %v1916_v53, %v1663_v52 }
  0xc8   :  { %v2377_v31 = vmul.f32 0.125, %v348_v19  ;;  %v380_v32 = vadd.f32 %v379_v20, %v378_v8  ;;  %v341_v38 = vrot.slane %v340_v25, 1  ;;  %v372_v39 = vadd.f32 %v371_v26, %v370_v14  ;;  %v322_v40 = vpop.f32.mrf.mxu2  ;;  %v1936_v14 = vld [vmem:[#allocation7 + $0x1d4] sm:$0xf0]  ;;  %v1607_v26 = vld [vmem:[#allocation7 + $0xc0] sm:$0xf] }
  0xc9   :  { %v353_v46 = vrot.slane %v352_v33, 1  ;;  %v384_v47 = vadd.f32 %v383_v34, %v382_v22  ;;  %v1616_v8 = vor.u32 %v1904_v3, %v1615_v63  ;;  %906 = vmatpush.bf16.msra.mxu0 %v1552_v2  ;;  %v1680_v13 = vor.u32 %v1920_v9, %v1679_v4  ;;  %v1882_v2 = vld [vmem:[#allocation7 + $0x24] sm:$0xf0]  ;;  %v1591_v3 = vld [vmem:[#allocation7 + $0xa0] sm:$0xf] }
  0xca   :  { %v394_v44 = vmul.f32 0.125, %v380_v32  ;;  %v398_v45 = vmul.f32 %v2377_v31, %v2377_v31  ;;  %v342_v49 = vadd.f32 %v341_v38, %v340_v25  ;;  %v373_v50 = vrot.slane %v372_v39, 1  ;;  %v1918_v32 = vld [vmem:[#allocation7 + $0x144] sm:$0xf0]  ;;  %v1655_v9 = vld [vmem:[#allocation7 + $0x120] sm:$0xf] }
  0xcb   :  { %v354_v57 = vadd.f32 %v353_v46, %v352_v33  ;;  %v385_v59 = vrot.slane %v384_v47, 1  ;;  %v1744_v20 = vor.u32 %v1936_v14, %v1743_v10  ;;  %919 = vmatpush.bf16.msrb.mxu1 %v1616_v8  ;;  %932 = vmatpush.bf16.msrb.mxu2 %v1680_v13  ;;  %v1544_v25 = vor.u32 %v1886_v21, %v1543_v15  ;;  %v1735_v33 = vld [vmem:[#allocation7 + $0x1c0] sm:$0xf]  ;;  %v1934_v38 = vld [vmem:[#allocation7 + $0x1c4] sm:$0xf0] }
  0xcc   :  { %v402_v56 = vsub.f32 %v394_v44, %v398_v45  ;;  %v2381_v0 = vmul.f32 0.125, %v342_v49  ;;  %v374_v1 = vadd.f32 %v373_v50, %v372_v39  ;;  %v1608_v29 = vor.u32 %v1902_v27, %v1607_v26  ;;  %v1535_v39 = vld [vmem:[#allocation7 + $0x30] sm:$0xf]  ;;  %v1898_v8 = vld [vmem:[#allocation7 + $0xa4] sm:$0xf0] }
  0xcd   :  { %v2383_v6 = vmul.f32 0.125, %v354_v57  ;;  %v386_v7 = vadd.f32 %v385_v59, %v384_v47  ;;  %945 = vmatpush.bf16.msra.mxu3 %v1744_v20  ;;  %907 = vmatpush.bf16.msra.mxu0 %v1544_v25  ;;  %v1672_v37 = vor.u32 %v1918_v32, %v1671_v30  ;;  %v1736_v41 = vor.u32 %v1934_v38, %v1735_v33  ;;  %v1932_v57 = vld [vmem:[#allocation7 + $0x1b4] sm:$0xf0]  ;;  %v1719_v13 = vld [vmem:[#allocation7 + $0x1a0] sm:$0xf] }
  0xce   :  { %v406_v5 = vmax.f32 %v402_v56, 0.0  ;;  %v393_v11 = vmul.f32 0.125, %v374_v1  ;;  %v397_v12 = vmul.f32 %v2381_v0, %v2381_v0  ;;  %v1536_v47 = vor.u32 %v1884_v42, %v1535_v39  ;;  %v1727_v56 = vld [vmem:[#allocation7 + $0x1b0] sm:$0xf]  ;;  %v1527_v1 = vld [vmem:[#allocation7 + $0x20] sm:$0xf] }
  0xcf   :  { %v395_v17 = vmul.f32 0.125, %v386_v7  ;;  %v399_v18 = vmul.f32 %v2383_v6, %v2383_v6  ;;  %v2391_v19 = vpop.f32.mrf.mxu3  ;;  %920 = vmatpush.bf16.msrb.mxu1 %v1608_v29  ;;  %933 = vmatpush.bf16.msrb.mxu2 %v1672_v37  ;;  %v1600_v50 = vor.u32 %v1900_v48, %v1599_v43  ;;  %v1728_v63 = vor.u32 %v1932_v57, %v1727_v56  ;;  %v1519_v20 = vld [vmem:[#allocation7 + $0x10] sm:$0xf]  ;;  %v1912_v33 = vld [vmem:[#allocation7 + $0x114] sm:$0xf0] }
  0xd0   :  { %v2387_v16 = vadd.f32 1e-05, %v406_v5  ;;  %v401_v22 = vsub.f32 %v393_v11, %v397_v12  ;;  %v355_v23 = vrot.slane %v2391_v19, 4  ;;  %v368_v24 = vmul.f32 %v2391_v19, %v2391_v19  ;;  %v1914_v12 = vld [vmem:[#allocation7 + $0x124] sm:$0xf0] }
  0xd1   :  { %v403_v28 = vsub.f32 %v395_v17, %v399_v18  ;;  %946 = vmatpush.bf16.msra.mxu3 %v1736_v41  ;;  %908 = vmatpush.bf16.msra.mxu0 %v1536_v47  ;;  %v1528_v10 = vor.u32 %v1882_v2, %v1527_v1  ;;  %v1592_v11 = vor.u32 %v1898_v8, %v1591_v3  ;;  %v1930_v18 = vld [vmem:[#allocation7 + $0x1a4] sm:$0xf0]  ;;  %v1647_v29 = vld [vmem:[#allocation7 + $0x110] sm:$0xf]  ;;  %v1511_v39 = vld [vmem:[#allocation7] sm:$0xf] }
  0xd2   :  { %1982 = vrsqrt.f32 %v2387_v16  ;;  %v405_v34 = vmax.f32 %v401_v22, 0.0  ;;  %v356_v35 = vadd.f32 %v355_v23, %v2391_v19  ;;  %v387_v36 = vrot.slane %v368_v24, 4  ;;  %v1880_v23 = vld [vmem:[#allocation7 + $0x14] sm:$0xf0]  ;;  %v1894_v47 = vld [vmem:[#allocation7 + $0x84] sm:$0xf0] }
  0xd3   :  { %v407_v40 = vmax.f32 %v403_v28, 0.0  ;;  %921 = vmatpush.bf16.msrb.mxu1 %v1600_v50  ;;  %934 = vmatpush.bf16.msrb.mxu2 %v1664_v62  ;;  %v1656_v17 = vor.u32 %v1914_v12, %v1655_v9  ;;  %v1720_v22 = vor.u32 %v1930_v18, %v1719_v13  ;;  %v1520_v27 = vor.u32 %v1880_v23, %v1519_v20  ;;  %v1896_v28 = vld [vmem:[#allocation7 + $0x94] sm:$0xf0]  ;;  %v1639_v53 = vld [vmem:[#allocation7 + $0x100] sm:$0xf] }
  0xd4   :  { %v2398_v44 = vadd.f32 1e-05, %v405_v34  ;;  %v357_v45 = vrot.slane %v356_v35, 2  ;;  %v388_v46 = vadd.f32 %v387_v36, %v368_v24  ;;  %v1583_v24 = vld [vmem:[#allocation7 + $0x90] sm:$0xf]  ;;  %v1648_v43 = vor.u32 %v1912_v33, %v1647_v29 }
  0xd5   :  { %v2400_v49 = vadd.f32 1e-05, %v407_v40  ;;  %947 = vmatpush.bf16.msra.mxu3 %v1728_v63  ;;  %909 = vmatpush.bf16.msra.mxu0 %v1528_v10  ;;  %v1584_v32 = vor.u32 %v1896_v28, %v1583_v24  ;;  %v1711_v34 = vld [vmem:[#allocation7 + $0x190] sm:$0xf]  ;;  %v1878_v40 = vld [vmem:[#allocation7 + $0x4] sm:$0xf0]  ;;  %vm430_vm1 = vweird.f32 %v2387_v16 }
  0xd6   :  { %v358_v54 = vadd.f32 %v357_v45, %v356_v35  ;;  %v389_v55 = vrot.slane %v388_v46, 2  ;;  %v1928_v35 = vld [vmem:[#allocation7 + $0x194] sm:$0xf0]  ;;  %v1512_v50 = vor.u32 %v1878_v40, %v1511_v39  ;;  %v1926_v62 = vld [vmem:[#allocation7 + $0x184] sm:$0xf0]  ;;  %vm420_vm5 = vweird.f32 %v2398_v44 }
  0xd7   :  { %1984 = vrsqrt.f32 %v2400_v49  ;;  %v335_v60 = vpop.f32.mrf.mxu3  ;;  %922 = vmatpush.bf16.msrb.mxu1 %v1592_v11  ;;  %935 = vmatpush.bf16.msrb.mxu2 %v1656_v17  ;;  %v1712_v45 = vor.u32 %v1928_v35, %v1711_v34  ;;  %v1891_v63 = vld [vmem:[#allocation7 + $0x74] sm:$0xf]  ;;  %v1569_v2 = vld [vmem:[#allocation7 + $0x78] sm:$0xf0]  ;;  %v1905_v23 = vld [vmem:[#allocation7 + $0xe4] sm:$0xf]  ;;  %vm440_vm6 = vweird.f32 %v2400_v49 }
  0xd8   :  { %v2402_v59 = vpop.eup %1982  ;;  %1986 = vrsqrt.f32 %v2398_v44  ;;  %v359_v5 = vrot.slane %v358_v54, 1  ;;  %v390_v7 = vadd.f32 %v389_v55, %v388_v46  ;;  %v1575_v46 = vld [vmem:[#allocation7 + $0x80] sm:$0xf]  ;;  %v1907_v3 = vld [vmem:[#allocation7 + $0xf4] sm:$0xf] }
  0xd9   :  { %v425_v4 = vmul.f32 %v2402_v59, %v2387_v16  ;;  %948 = vmatpush.bf16.msra.mxu3 %v1720_v22  ;;  %910 = vmatpush.bf16.msra.mxu0 %v1520_v27  ;;  %v1576_v52 = vor.u32 %v1894_v47, %v1575_v46  ;;  %v1703_v55 = vld [vmem:[#allocation7 + $0x180] sm:$0xf]  ;;  %v1923_v11 = vld [vmem:[#allocation7 + $0x174] sm:$0xf]  ;;  %v1697_v12 = vld [vmem:[#allocation7 + $0x178] sm:$0xf0]  ;;  %vm431_vm2 = vweird.f32 %v2402_v59 }
  0xda   :  { %v360_v14 = vadd.f32 %v359_v5, %v358_v54  ;;  %v391_v15 = vrot.slane %v390_v7, 1  ;;  %v1910_v54 = vld [vmem:[#allocation7 + $0x104] sm:$0xf0]  ;;  %v1704_v1 = vor.u32 %v1926_v62, %v1703_v55  ;;  %v1572_v5 = vor.u32 %v1891_v63, %v1569_v2  ;;  %v1939_v17 = vld [vmem:[#allocation7 + $0x1f4] sm:$0xf]  ;;  %vm2437_vm3 = vmor %vm430_vm1, %vm431_vm2 }
  0xdb   :  { %v426_v21 = vmul.f32 %v2402_v59, %v425_v4  ;;  %923 = vmatpush.bf16.msrb.mxu1 %v1584_v32  ;;  %936 = vmatpush.bf16.msrb.mxu2 %v1648_v43  ;;  %v1640_v60 = vor.u32 %v1910_v54, %v1639_v53  ;;  %v1761_v18 = vld [vmem:[#allocation7 + $0x1f8] sm:$0xf0]  ;;  %v1561_v22 = vld [vmem:[#allocation7 + $0x68] sm:$0xf0]  ;;  %v1921_v27 = vld [vmem:[#allocation7 + $0x164] sm:$0xf] }
  0xdc   :  { %v2409_v25 = vmul.f32 0.125, %v360_v14  ;;  %v392_v26 = vadd.f32 %v391_v15, %v390_v7  ;;  %v1633_v7 = vld [vmem:[#allocation7 + $0xf8] sm:$0xf0]  ;;  %v1700_v15 = vor.u32 %v1923_v11, %v1697_v12  ;;  %v1764_v20 = vor.u32 %v1939_v17, %v1761_v18  ;;  %v1689_v28 = vld [vmem:[#allocation7 + $0x168] sm:$0xf0] }
  0xdd   :  { %v2411_v30 = vpop.eup %1984  ;;  %v2417_v41 = vmul.f32 0.5, %v426_v21  ;;  %949 = vmatpush.bf16.msra.mxu3 %v1712_v45  ;;  %911 = vmatpush.bf16.msra.mxu0 %v1512_v50  ;;  %v1636_v10 = vor.u32 %v1907_v3, %v1633_v7  ;;  %v1889_v21 = vld [vmem:[#allocation7 + $0x64] sm:$0xf]  ;;  %v1692_v32 = vor.u32 %v1921_v27, %v1689_v28  ;;  %v1753_v34 = vld [vmem:[#allocation7 + $0x1e8] sm:$0xf0] }
  0xde   :  { %v2413_v36 = vpop.eup %1986  ;;  %v435_v37 = vmul.f32 %v2411_v30, %v2400_v49  ;;  %v396_v38 = vmul.f32 0.125, %v392_v26  ;;  %v400_v42 = vmul.f32 %v2409_v25, %v2409_v25  ;;  %v1564_v24 = vor.u32 %v1889_v21, %v1561_v22  ;;  %v1625_v26 = vld [vmem:[#allocation7 + $0xe8] sm:$0xf0]  ;;  %v1937_v33 = vld [vmem:[#allocation7 + $0x1e4] sm:$0xf] }
  0xdf   :  { %v415_v56 = vmul.f32 %v2413_v36, %v2398_v44  ;;  %v428_v8 = vsub.f32 1.5, %v2417_v41  ;;  %924 = vmatpush.bf16.msrb.mxu1 %v1576_v52  ;;  %937 = vmatpush.bf16.msrb.mxu2 %v1640_v60  ;;  %v1628_v29 = vor.u32 %v1905_v23, %v1625_v26  ;;  %v1887_v35 = vld [vmem:[#allocation7 + $0x54] sm:$0xf]  ;;  %v1756_v40 = vor.u32 %v1937_v33, %v1753_v34  ;;  %v1553_v41 = vld [vmem:[#allocation7 + $0x58] sm:$0xf0] }
  0xe0   :  { %v436_v48 = vmul.f32 %v2411_v30, %v435_v37  ;;  %v404_v57 = vsub.f32 %v396_v38, %v400_v42  ;;  %v1903_v42 = vld [vmem:[#allocation7 + $0xd4] sm:$0xf]  ;;  %v1556_v43 = vor.u32 %v1887_v35, %v1553_v41  ;;  %v1617_v45 = vld [vmem:[#allocation7 + $0xd8] sm:$0xf0]  ;;  %v1885_v54 = vld [vmem:[#allocation7 + $0x44] sm:$0xf]  ;;  %vm421_vm4 = vweird.f32 %v2413_v36 }
  0xe1   :  { %v416_v13 = vmul.f32 %v2413_v36, %v415_v56  ;;  %950 = vmatpush.bf16.msra.mxu3 %v1704_v1  ;;  %956 = vmatpush.bf16.msrb.mxu0 %v1572_v5  ;;  %v1919_v46 = vld [vmem:[#allocation7 + $0x154] sm:$0xf]  ;;  %v1681_v47 = vld [vmem:[#allocation7 + $0x158] sm:$0xf0]  ;;  %v1620_v16 = vor.u32 %v1903_v42, %v1617_v45  ;;  %v1545_v56 = vld [vmem:[#allocation7 + $0x48] sm:$0xf0]  ;;  %vm441_vm7 = vweird.f32 %v2411_v30 }
  0xe2   :  { %v408_v4 = vmax.f32 %v404_v57, 0.0  ;;  %v2425_v9 = vmul.f32 0.5, %v436_v48  ;;  %v429_v48 = vmul.f32 %v2402_v59, %v428_v8  ;;  %v1684_v50 = vor.u32 %v1919_v46, %v1681_v47  ;;  %v1935_v52 = vld [vmem:[#allocation7 + $0x1d4] sm:$0xf]  ;;  %v1745_v53 = vld [vmem:[#allocation7 + $0x1d8] sm:$0xf0]  ;;  %vm2459_vm8 = vmor %vm420_vm5, %vm421_vm4 }
  0xe3   :  { %969 = vmatpush.bf16.msra.mxu1 %v1636_v10  ;;  %982 = vmatpush.bf16.msra.mxu2 %v1700_v15  ;;  %v2441_v38 = vmul.f32 0.5, %v416_v13  ;;  %v1748_v55 = vor.u32 %v1935_v52, %v1745_v53  ;;  %v1901_v57 = vld [vmem:[#allocation7 + $0xc4] sm:$0xf]  ;;  %v1609_v60 = vld [vmem:[#allocation7 + $0xc8] sm:$0xf0]  ;;  %vm2470_vm13 = vmor %vm440_vm6, %vm441_vm7 }
  0xe4   :  { %v2428_v14 = vadd.f32 1e-05, %v408_v4  ;;  %v438_v39 = vsub.f32 1.5, %v2425_v9  ;;  %v1917_v63 = vld [vmem:[#allocation7 + $0x144] sm:$0xf]  ;;  %v1548_v4 = vor.u32 %v1885_v54, %v1545_v56  ;;  %v1612_v5 = vor.u32 %v1901_v57, %v1609_v60 }
  0xe5   :  { %995 = vmatpush.bf16.msrb.mxu3 %v1764_v20  ;;  %957 = vmatpush.bf16.msrb.mxu0 %v1564_v24  ;;  %v1673_v1 = vld [vmem:[#allocation7 + $0x148] sm:$0xf0]  ;;  %v1933_v2 = vld [vmem:[#allocation7 + $0x1c4] sm:$0xf]  ;;  %v433_v8 = vsel %vm2437_vm3, %v2402_v59, %v429_v48  ;;  %v418_v44 = vsub.f32 1.5, %v2441_v38 }
  0xe6   :  { %1988 = vrsqrt.f32 %v2428_v14  ;;  %v1737_v7 = vld [vmem:[#allocation7 + $0x1c8] sm:$0xf0]  ;;  %v1676_v9 = vor.u32 %v1917_v63, %v1673_v1  ;;  %v439_v12 = vmul.f32 %v2411_v30, %v438_v39  ;;  %v1883_v13 = vld [vmem:[#allocation7 + $0x34] sm:$0xf]  ;;  %v1537_v15 = vld [vmem:[#allocation7 + $0x38] sm:$0xf0]  ;;  %vm450_vm14 = vweird.f32 %v2428_v14 }
  0xe7   :  { %970 = vmatpush.bf16.msra.mxu1 %v1628_v29  ;;  %983 = vmatpush.bf16.msra.mxu2 %v1692_v32  ;;  %v1740_v59 = vor.u32 %v1933_v2, %v1737_v7  ;;  %v1899_v17 = vld [vmem:[#allocation7 + $0xb4] sm:$0xf]  ;;  %v458_v18 = vrot.slane %v433_v8, 7  ;;  %v1540_v22 = vor.u32 %v1883_v13, %v1537_v15  ;;  %v1601_v23 = vld [vmem:[#allocation7 + $0xb8] sm:$0xf0]  ;;  %v419_v32 = vmul.f32 %v2413_v36, %v418_v44 }
  0xe8   :  { %v1915_v24 = vld [vmem:[#allocation7 + $0x134] sm:$0xf]  ;;  %v1604_v26 = vor.u32 %v1899_v17, %v1601_v23  ;;  %v1665_v27 = vld [vmem:[#allocation7 + $0x138] sm:$0xf0]  ;;  %v1881_v37 = vld [vmem:[#allocation7 + $0x24] sm:$0xf] }
  0xe9   :  { %996 = vmatpush.bf16.msrb.mxu3 %v1756_v40  ;;  %958 = vmatpush.bf16.msrb.mxu0 %v1556_v43  ;;  %v1931_v28 = vld [vmem:[#allocation7 + $0x1b4] sm:$0xf]  ;;  %v1729_v29 = vld [vmem:[#allocation7 + $0x1b8] sm:$0xf0]  ;;  %v1668_v34 = vor.u32 %v1915_v24, %v1665_v27  ;;  %v1529_v38 = vld [vmem:[#allocation7 + $0x28] sm:$0xf0] }
  0xea   :  { %v1732_v35 = vor.u32 %v1931_v28, %v1729_v29  ;;  %v1897_v39 = vld [vmem:[#allocation7 + $0xa4] sm:$0xf]  ;;  %v1593_v40 = vld [vmem:[#allocation7 + $0xa8] sm:$0xf0]  ;;  %v1532_v43 = vor.u32 %v1881_v37, %v1529_v38  ;;  %v1521_v52 = vld [vmem:[#allocation7 + $0x18] sm:$0xf0] }
  0xeb   :  { %971 = vmatpush.bf16.msra.mxu1 %v1620_v16  ;;  %984 = vmatpush.bf16.msra.mxu2 %v1684_v50  ;;  %v1913_v41 = vld [vmem:[#allocation7 + $0x124] sm:$0xf]  ;;  %v1596_v45 = vor.u32 %v1897_v39, %v1593_v40  ;;  %v1657_v46 = vld [vmem:[#allocation7 + $0x128] sm:$0xf0]  ;;  %v1879_v50 = vld [vmem:[#allocation7 + $0x14] sm:$0xf] }
  0xec   :  { %v2445_v62 = vpop.eup %1988  ;;  %v1929_v47 = vld [vmem:[#allocation7 + $0x1a4] sm:$0xf]  ;;  %v1721_v48 = vld [vmem:[#allocation7 + $0x1a8] sm:$0xf0]  ;;  %v1660_v16 = vor.u32 %v1913_v41, %v1657_v46  ;;  %v1895_v53 = vld [vmem:[#allocation7 + $0x94] sm:$0xf] }
  0xed   :  { %v445_v3 = vmul.f32 %v2445_v62, %v2428_v14  ;;  %997 = vmatpush.bf16.msrb.mxu3 %v1748_v55  ;;  %vm451_vm11 = vweird.f32 %v2445_v62  ;;  %959 = vmatpush.bf16.msrb.mxu0 %v1548_v4  ;;  %v443_v14 = vsel %vm2470_vm13, %v2411_v30, %v439_v12  ;;  %v423_v30 = vsel %vm2459_vm8, %v2413_v36, %v419_v32  ;;  %v1585_v56 = vld [vmem:[#allocation7 + $0x98] sm:$0xf0]  ;;  %v1911_v57 = vld [vmem:[#allocation7 + $0x114] sm:$0xf]  ;;  %v1877_v7 = vld [vmem:[#allocation7 + $0x4] sm:$0xf] }
  0xee   :  { %vm2478_vm15 = vmor %vm450_vm14, %vm451_vm11  ;;  %v1724_v55 = vor.u32 %v1929_v47, %v1721_v48  ;;  %v1649_v60 = vld [vmem:[#allocation7 + $0x118] sm:$0xf0]  ;;  %v459_v63 = vrot.slane %v443_v14, 6  ;;  %v1927_v2 = vld [vmem:[#allocation7 + $0x194] sm:$0xf]  ;;  %v1524_v36 = vor.u32 %v1879_v50, %v1521_v52 }
  0xef   :  { %v446_v11 = vmul.f32 %v2445_v62, %v445_v3  ;;  %972 = vmatpush.bf16.msra.mxu1 %v1612_v5  ;;  %985 = vmatpush.bf16.msra.mxu2 %v1676_v9  ;;  %v1713_v3 = vld [vmem:[#allocation7 + $0x198] sm:$0xf0]  ;;  %v409_v4 = vld [vmem:[%s2550_s5] sm:$0xf]  ;;  %v1588_v5 = vor.u32 %v1895_v53, %v1585_v56  ;;  %v1652_v9 = vor.u32 %v1911_v57, %v1649_v60  ;;  %v1513_v44 = vld [vmem:[#allocation7 + $0x8] sm:$0xf0] }
  0xf0   :  { %v1893_v10 = vld [vmem:[#allocation7 + $0x84] sm:$0xf]  ;;  %v1716_v12 = vor.u32 %v1927_v2, %v1713_v3  ;;  %v1641_v15 = vld [vmem:[#allocation7 + $0x108] sm:$0xf0]  ;;  %v469_v39 = vld [vmem:[#allocation11] sm:$0xf] }
  0xf1   :  { %v447_v21 = vmul.f32 0.5, %v446_v11  ;;  %998 = vmatpush.bf16.msrb.mxu3 %v1740_v59  ;;  %960 = vmatpush.bf16.msrb.mxu0 %v1540_v22  ;;  %v1577_v11 = vld [vmem:[#allocation7 + $0x88] sm:$0xf0]  ;;  %v1909_v13 = vld [vmem:[#allocation7 + $0x104] sm:$0xf]  ;;  %v1516_v22 = vor.u32 %v1877_v7, %v1513_v44 }
  0xf2   :  { %v1925_v20 = vld [vmem:[#allocation7 + $0x184] sm:$0xf]  ;;  %v1644_v27 = vor.u32 %v1909_v13, %v1641_v15 }
  0xf3   :  { %v448_v49 = vsub.f32 1.5, %v447_v21  ;;  %973 = vmatpush.bf16.msra.mxu1 %v1604_v26  ;;  %986 = vmatpush.bf16.msra.mxu2 %v1668_v34  ;;  %v1705_v21 = vld [vmem:[#allocation7 + $0x188] sm:$0xf0] }
  0xf4   :  { %v1708_v29 = vor.u32 %v1925_v20, %v1705_v21 }
  0xf5   :  { %v449_v42 = vmul.f32 %v2445_v62, %v448_v49  ;;  %999 = vmatpush.bf16.msrb.mxu3 %v1732_v35  ;;  %961 = vmatpush.bf16.msrb.mxu0 %v1532_v43 }
  0xf7   :  { %v453_v54 = vsel %vm2478_vm15, %v2445_v62, %v449_v42  ;;  %974 = vmatpush.bf16.msra.mxu1 %v1596_v45  ;;  %v462_v62 = vsel %vm461_vm9, %v423_v30, %v458_v18  ;;  %987 = vmatpush.bf16.msra.mxu2 %v1660_v16  ;;  %v1580_v18 = vor.u32 %v1893_v10, %v1577_v11 }
  0xf8   :  { %v460_v1 = vrot.slane %v453_v54, 5 }
  0xf9   :  { %1000 = vmatpush.bf16.msrb.mxu3 %v1724_v55  ;;  %962 = vmatpush.bf16.msrb.mxu0 %v1524_v36 }
  0xfa   :  { %v464_v8 = vsel %vm463_vm10, %v459_v63, %v460_v1 }
  0xfb   :  { %v466_v59 = vsel %vm465_vm12, %v462_v62, %v464_v8  ;;  %975 = vmatpush.bf16.msra.mxu1 %v1588_v5  ;;  %988 = vmatpush.bf16.msra.mxu2 %v1652_v9 }
  0xfc   :  { %v468_v17 = vmul.f32 %v466_v59, %v409_v4 }
  0xfd   :  { %1001 = vmatpush.bf16.msrb.mxu3 %v1716_v12  ;;  %963 = vmatpush.bf16.msrb.mxu0 %v1516_v22 }
  0xfe   :  { %v473_v23 = vperm.slane %v468_v17, 2  ;;  %v474_v24 = vperm.slane %v468_v17, 3  ;;  %v472_v26 = vperm.slane %v468_v17, 1  ;;  %v471_v28 = vperm.slane %v468_v17, 0 }
  0xff   :  { %976 = vmatpush.bf16.msra.mxu1 %v1580_v18  ;;  %989 = vmatpush.bf16.msra.mxu2 %v1644_v27 }
 0x100   :  { %v481_v32 = vmul.f32 %v473_v23, %v2383_v6  ;;  %v482_v49 = vmul.f32 %v474_v24, %v2409_v25  ;;  %v480_v33 = vmul.f32 %v472_v26, %v2377_v31  ;;  %v479_v37 = vmul.f32 %v471_v28, %v2381_v0 }
 0x101   :  { %1002 = vmatpush.bf16.msrb.mxu3 %v1708_v29  ;;  %v498_v25 = vmul.f32 %v474_v24, %v2391_v19  ;;  %v495_v31 = vmul.f32 %v471_v28, %v2365_v58  ;;  %v496_v42 = vmul.f32 %v472_v26, %v2359_v51  ;;  %v497_v43 = vmul.f32 %v473_v23, %v2370_v61 }
 0x102   :  { %v488_v34 = vrot.slane %v481_v32, 6  ;;  %v489_v35 = vrot.slane %v482_v49, 5  ;;  %v487_v38 = vrot.slane %v480_v33, 7  ;;  %v1948_v49 = vld [vmem:[#allocation8 + $0x38] sm:$0xff] }
 0x103   :  { %v1956_v33 = vld [vmem:[#allocation8 + $0x78] sm:$0xff] }
 0x104   :  { %v491_v14 = vsel %vm463_vm10, %v488_v34, %v489_v35  ;;  %v490_v40 = vsel %vm461_vm9, %v479_v37, %v487_v38 }
 0x105   :  { %v492_v6 = vsel %vm465_vm12, %v490_v40, %v491_v14  ;;  %v1947_v40 = vld [vmem:[#allocation8 + $0x30] sm:$0xff]  ;;  %vm1430_vm12 = vcmask 7168  }
 0x106   :  { %v494_v41 = vsub.f32 %v469_v39, %v492_v6  ;;  %v1955_v6 = vld [vmem:[#allocation8 + $0x70] sm:$0xff] }
 0x108   :  { %v500_v45 = vperm.slane %v494_v41, 0  ;;  %v501_v0 = vperm.slane %v494_v41, 1  ;;  %v502_v46 = vperm.slane %v494_v41, 2  ;;  %v503_v47 = vperm.slane %v494_v41, 3 }
 0x10a   :  { %v508_v48 = vadd.f32 %v500_v45, %v495_v31  ;;  %v509_v16 = vadd.f32 %v501_v0, %v496_v42  ;;  %v510_v50 = vadd.f32 %v502_v46, %v497_v43  ;;  %v511_v52 = vadd.f32 %v503_v47, %v498_v25  ;;  %v1946_v46 = vld [vmem:[#allocation8 + $0x28] sm:$0xff] }
 0x10b   :  { %v1954_v47 = vld [vmem:[#allocation8 + $0x68] sm:$0xff] }
 0x10c   :  { %v512_v53 = vmax.f32 %v508_v48, 0.0  ;;  %v513_v30 = vmax.f32 %v509_v16, 0.0  ;;  %v514_v54 = vmax.f32 %v510_v50, 0.0  ;;  %v515_v55 = vmax.f32 %v511_v52, 0.0 }
 0x10e   :  { %v516_v56 = vpack.c.bf16 %v512_v53, %v512_v53  ;;  %v517_v19 = vpack.c.bf16 %v513_v30, %v513_v30  ;;  %v518_v57 = vpack.c.bf16 %v514_v54, %v514_v54  ;;  %v519_v58 = vpack.c.bf16 %v515_v55, %v515_v55  ;;  %v1945_v30 = vld [vmem:[#allocation8 + $0x20] sm:$0xff] }
 0x10f   :  { %v1953_v54 = vld [vmem:[#allocation8 + $0x60] sm:$0xff] }
 0x110   :  { %912 = vmatmul.bf16.vlgmr.msra.gmra.mxu0 %v516_v56  ;;  %925 = vmatmul.bf16.vlgmr.msrb.gmra.mxu1 %v517_v19 }
 0x111   :  { %938 = vmatmul.bf16.vlgmr.msrb.gmra.mxu2 %v518_v57  ;;  %951 = vmatmul.bf16.vlgmr.msra.gmra.mxu3 %v519_v58 }
 0x112   :  { %1228 = vmatpush.bf16.msra.mxu0 %v1948_v49  ;;  %1241 = vmatpush.bf16.msrb.mxu1 %v1956_v33 }
 0x116   :  { %1229 = vmatpush.bf16.msra.mxu0 %v1947_v40  ;;  %1242 = vmatpush.bf16.msrb.mxu1 %v1955_v6 }
 0x11a   :  { %1230 = vmatpush.bf16.msra.mxu0 %v1946_v46  ;;  %1243 = vmatpush.bf16.msrb.mxu1 %v1954_v47  ;;  %v1964_v47 = vld [vmem:[#allocation10 + $0x38] sm:$0xff] }
 0x11b   :  { %1362 = vmatpush.bf16.msrb.mxu2 %v1964_v47 }
 0x11e   :  { %1231 = vmatpush.bf16.msra.mxu0 %v1945_v30  ;;  %1244 = vmatpush.bf16.msrb.mxu1 %v1953_v54 }
 0x120   :  { %964 = vmatmul.bf16.vlgmr.msrb.gmra.mxu0 %v516_v56  ;;  %977 = vmatmul.bf16.vlgmr.msra.gmra.mxu1 %v517_v19 }
 0x121   :  { %990 = vmatmul.bf16.vlgmr.msra.gmra.mxu2 %v518_v57  ;;  %1003 = vmatmul.bf16.vlgmr.msrb.gmra.mxu3 %v519_v58  ;;  %v1944_v58 = vld [vmem:[#allocation8 + $0x18] sm:$0xff] }
 0x122   :  { %1232 = vmatpush.bf16.msra.mxu0 %v1944_v58  ;;  %v1960_v58 = vld [vmem:[#allocation10 + $0x18] sm:$0xff] }
 0x18d   :  { %v913_v51 = vpop.f32.mrf.mxu0  ;;  %v926_v61 = vpop.f32.mrf.mxu1 }
 0x18e   :  { %v927_v60 = vadd.f32 %v926_v61, %v913_v51  ;;  %v1952_v51 = vld [vmem:[#allocation8 + $0x58] sm:$0xff] }
 0x18f   :  { %1245 = vmatpush.bf16.msrb.mxu1 %v1952_v51 }
 0x194   :  { %v939_v63 = vpop.f32.mrf.mxu2  ;;  %v952_v1 = vpop.f32.mrf.mxu3 }
 0x195   :  { %v940_v2 = vadd.f32 %v939_v63, %v927_v60  ;;  %v915_v3 = vpop.f32.mrf.mxu0  ;;  %v928_v4 = vpop.f32.mrf.mxu1 }
 0x197   :  { %v2509_v36 = vadd.f32 %v952_v1, %v940_v2  ;;  %v1943_v1 = vld [vmem:[#allocation8 + $0x10] sm:$0xff] }
 0x198   :  { %v1951_v2 = vld [vmem:[#allocation8 + $0x50] sm:$0xff]  ;;  %1233 = vmatpush.bf16.msra.mxu0 %v1943_v1 }
 0x199   :  { %v1008_v5 = vrot.slane %v2509_v36, 4  ;;  %v1022_v7 = vmul.f32 %v2509_v36, %v2509_v36  ;;  %1246 = vmatpush.bf16.msrb.mxu1 %v1951_v2  ;;  %v1959_v1 = vld [vmem:[#allocation10 + $0x10] sm:$0xff] }
 0x19b   :  { %v1009_v62 = vadd.f32 %v1008_v5, %v2509_v36  ;;  %v1024_v8 = vrot.slane %v1022_v7, 4  ;;  %v1942_v5 = vld [vmem:[#allocation8 + $0x8] sm:$0xff] }
 0x19c   :  { %v941_v9 = vpop.f32.mrf.mxu2  ;;  %v954_v44 = vpop.f32.mrf.mxu3  ;;  %1234 = vmatpush.bf16.msra.mxu0 %v1942_v5 }
 0x19d   :  { %v1010_v10 = vrot.slane %v1009_v62, 2  ;;  %v1025_v11 = vadd.f32 %v1024_v8, %v1022_v7  ;;  %v965_v59 = vpop.f32.mrf.mxu0  ;;  %v978_v12 = vpop.f32.mrf.mxu1  ;;  %v1950_v7 = vld [vmem:[#allocation8 + $0x48] sm:$0xff]  ;;  %v1941_v9 = vld [vmem:[#allocation8] sm:$0xff] }
 0x19e   :  { %v979_v18 = vadd.f32 %v978_v12, %v965_v59  ;;  %1247 = vmatpush.bf16.msrb.mxu1 %v1950_v7  ;;  %v1949_v44 = vld [vmem:[#allocation8 + $0x40] sm:$0xff]  ;;  %v1958_v7 = vld [vmem:[#allocation10 + $0x8] sm:$0xff] }
 0x19f   :  { %v1011_v13 = vadd.f32 %v1010_v10, %v1009_v62  ;;  %v1026_v15 = vrot.slane %v1025_v11, 2 }
 0x1a0   :  { %1235 = vmatpush.bf16.msra.mxu0 %v1941_v9  ;;  %v1957_v9 = vld [vmem:[#allocation10] sm:$0xff] }
 0x1a1   :  { %v1012_v17 = vrot.slane %v1011_v13, 1  ;;  %v1027_v20 = vadd.f32 %v1026_v15, %v1025_v11 }
 0x1a2   :  { %1248 = vmatpush.bf16.msrb.mxu1 %v1949_v44 }
 0x1a3   :  { %v1013_v21 = vadd.f32 %v1012_v17, %v1011_v13  ;;  %v1028_v22 = vrot.slane %v1027_v20, 1 }
 0x1a4   :  { %v991_v23 = vpop.f32.mrf.mxu2  ;;  %v1004_v24 = vpop.f32.mrf.mxu3 }
 0x1a5   :  { %v2515_v26 = vmul.f32 0.125, %v1013_v21  ;;  %v1029_v27 = vadd.f32 %v1028_v22, %v1027_v20  ;;  %v992_v28 = vadd.f32 %v991_v23, %v979_v18  ;;  %v967_v29 = vpop.f32.mrf.mxu0  ;;  %v980_v32 = vpop.f32.mrf.mxu1  ;;  %v1044_v23 = vld [vmem:[%s2552_s7] sm:$0x3] }
 0x1a7   :  { %v1036_v34 = vmul.f32 0.125, %v1029_v27  ;;  %v1038_v35 = vmul.f32 %v2515_v26, %v2515_v26  ;;  %v2519_v37 = vadd.f32 %v1004_v24, %v992_v28 }
 0x1a9   :  { %v1040_v38 = vsub.f32 %v1036_v34, %v1038_v35  ;;  %v1014_v14 = vrot.slane %v2519_v37, 4  ;;  %v1023_v39 = vmul.f32 %v2519_v37, %v2519_v37  ;;  %v1073_v35 = vld [vmem:[#allocation13] sm:$0x3] }
 0x1ab   :  { %v1015_v41 = vadd.f32 %v1014_v14, %v2519_v37  ;;  %v1030_v25 = vrot.slane %v1023_v39, 4  ;;  %v1042_v43 = vmax.f32 %v1040_v38, 0.0 }
 0x1ac   :  { %v993_v31 = vpop.f32.mrf.mxu2  ;;  %v1006_v42 = vpop.f32.mrf.mxu3 }
 0x1ad   :  { %v1016_v45 = vrot.slane %v1015_v41, 2  ;;  %v1031_v0 = vadd.f32 %v1030_v25, %v1023_v39  ;;  %v1045_v50 = vadd.f32 1e-05, %v1042_v43 }
 0x1af   :  { %v1017_v48 = vadd.f32 %v1016_v45, %v1015_v41  ;;  %v1032_v16 = vrot.slane %v1031_v0, 2  ;;  %1990 = vrsqrt.f32 %v1045_v50  ;;  %vm1053_vm4 = vweird.f32 %v1045_v50 }
 0x1b1   :  { %v1018_v52 = vrot.slane %v1017_v48, 1  ;;  %v1033_v53 = vadd.f32 %v1032_v16, %v1031_v0 }
 0x1b3   :  { %v1019_v55 = vadd.f32 %v1018_v52, %v1017_v48  ;;  %v1034_v56 = vrot.slane %v1033_v53, 1 }
 0x1b5   :  { %v1021_v19 = vmul.f32 0.125, %v1019_v55  ;;  %v1035_v57 = vadd.f32 %v1034_v56, %v1033_v53  ;;  %v1991_v3 = vpop.eup %1990  ;;  %v1961_v53 = vld [vmem:[#allocation10 + $0x20] sm:$0xff] }
 0x1b6   :  { %v1048_v8 = vmul.f32 %v1991_v3, %v1045_v50  ;;  %vm1054_vm1 = vweird.f32 %v1991_v3  ;;  %v1962_v50 = vld [vmem:[#allocation10 + $0x28] sm:$0xff] }
 0x1b7   :  { %v1037_v61 = vmul.f32 0.125, %v1035_v57  ;;  %v1039_v60 = vmul.f32 %v1021_v19, %v1021_v19  ;;  %vm1055_vm5 = vmor %vm1053_vm4, %vm1054_vm1 }
 0x1b8   :  { %v1049_v10 = vmul.f32 %v1991_v3, %v1048_v8 }
 0x1b9   :  { %v1041_v63 = vsub.f32 %v1037_v61, %v1039_v60 }
 0x1ba   :  { %v1050_v59 = vmul.f32 0.5, %v1049_v10 }
 0x1bb   :  { %v1043_v4 = vmax.f32 %v1041_v63, 0.0 }
 0x1bc   :  { %v1051_v15 = vsub.f32 1.5, %v1050_v59 }
 0x1bd   :  { %v1046_v62 = vadd.f32 1e-05, %v1043_v4 }
 0x1be   :  { %v1052_v21 = vmul.f32 %v1991_v3, %v1051_v15 }
 0x1bf   :  { %1992 = vrsqrt.f32 %v1046_v62  ;;  %vm1063_vm2 = vweird.f32 %v1046_v62 }
 0x1c0   :  { %v1056_v27 = vsel %vm1055_vm5, %v1991_v3, %v1052_v21 }
 0x1c5   :  { %v1993_v11 = vpop.eup %1992 }
 0x1c6   :  { %v1058_v12 = vmul.f32 %v1993_v11, %v1046_v62  ;;  %vm1064_vm0 = vweird.f32 %v1993_v11 }
 0x1c7   :  { %vm1065_vm3 = vmor %vm1063_vm2, %vm1064_vm0 }
 0x1c8   :  { %v1059_v13 = vmul.f32 %v1993_v11, %v1058_v12 }
 0x1ca   :  { %v1060_v17 = vmul.f32 0.5, %v1059_v13 }
 0x1cc   :  { %v1061_v20 = vsub.f32 1.5, %v1060_v17 }
 0x1ce   :  { %v1062_v22 = vmul.f32 %v1993_v11, %v1061_v20  ;;  %v1272_v20 = vld [vmem:[%s2554_s9] sm:$0x1] }
 0x1d0   :  { %v1066_v18 = vsel %vm1065_vm3, %v1993_v11, %v1062_v22 }
 0x1d1   :  { %v1069_v24 = vrot.slane %v1066_v18, 7 }
 0x1d3   :  { %v1070_v28 = vsel %vm461_vm9, %v1056_v27, %v1069_v24 }
 0x1d4   :  { %v1072_v29 = vmul.f32 %v1070_v28, %v1044_v23  ;;  %v1285_v23 = vld [vmem:[#allocation14] sm:$0x1] }
 0x1d6   :  { %v1076_v32 = vperm.slane %v1072_v29, 1  ;;  %v1075_v49 = vperm.slane %v1072_v29, 0 }
 0x1d8   :  { %v1080_v33 = vmul.f32 %v1076_v32, %v1021_v19  ;;  %v1079_v38 = vmul.f32 %v1075_v49, %v2515_v26  ;;  %v1088_v40 = vmul.f32 %v1076_v32, %v2519_v37  ;;  %v1087_v6 = vmul.f32 %v1075_v49, %v2509_v36  ;;  %v1963_v26 = vld [vmem:[#allocation10 + $0x30] sm:$0xff] }
 0x1d9   :  { %1363 = vmatpush.bf16.msrb.mxu2 %v1963_v26 }
 0x1da   :  { %v1083_v34 = vrot.slane %v1080_v33, 7 }
 0x1dc   :  { %v1084_v14 = vsel %vm461_vm9, %v1079_v38, %v1083_v34 }
 0x1dd   :  { %v1086_v39 = vsub.f32 %v1073_v35, %v1084_v14  ;;  %1364 = vmatpush.bf16.msrb.mxu2 %v1962_v50 }
 0x1df   :  { %v1090_v41 = vperm.slane %v1086_v39, 0  ;;  %v1091_v25 = vperm.slane %v1086_v39, 1 }
 0x1e1   :  { %v1094_v31 = vadd.f32 %v1090_v41, %v1087_v6  ;;  %v1095_v42 = vadd.f32 %v1091_v25, %v1088_v40  ;;  %1365 = vmatpush.bf16.msrb.mxu2 %v1961_v53 }
 0x1e3   :  { %v1096_v43 = vmax.f32 %v1094_v31, 0.0  ;;  %v1097_v45 = vmax.f32 %v1095_v42, 0.0 }
 0x1e5   :  { %v1098_v0 = vpack.c.bf16 %v1096_v43, %v1096_v43  ;;  %v1099_v46 = vpack.c.bf16 %v1097_v45, %v1097_v45  ;;  %1366 = vmatpush.bf16.msrb.mxu2 %v1960_v58 }
 0x1e7   :  { %1236 = vmatmul.bf16.vlgmr.msra.gmra.mxu0 %v1098_v0  ;;  %1249 = vmatmul.bf16.vlgmr.msrb.gmra.mxu1 %v1099_v46 }
 0x1e9   :  { %1367 = vmatpush.bf16.msrb.mxu2 %v1959_v1 }
 0x1ed   :  { %1368 = vmatpush.bf16.msrb.mxu2 %v1958_v7 }
 0x1f1   :  { %1369 = vmatpush.bf16.msrb.mxu2 %v1957_v9 }
 0x264   :  { %v1237_v48 = vpop.f32.mrf.mxu0  ;;  %v1250_v16 = vpop.f32.mrf.mxu1 }
 0x265   :  { %v1251_v37 = vadd.f32 %v1250_v16, %v1237_v48 }
 0x267   :  { %v1254_v36 = vrot.slane %v1251_v37, 4  ;;  %v1261_v52 = vmul.f32 %v1251_v37, %v1251_v37 }
 0x269   :  { %v1255_v30 = vadd.f32 %v1254_v36, %v1251_v37  ;;  %v1262_v54 = vrot.slane %v1261_v52, 4 }
 0x26b   :  { %v1256_v55 = vrot.slane %v1255_v30, 2  ;;  %v1263_v56 = vadd.f32 %v1262_v54, %v1261_v52 }
 0x26c   :  { %v1239_v19 = vpop.f32.mrf.mxu0  ;;  %v1252_v57 = vpop.f32.mrf.mxu1 }
 0x26d   :  { %v1257_v51 = vadd.f32 %v1256_v55, %v1255_v30  ;;  %v1264_v61 = vrot.slane %v1263_v56, 2 }
 0x26f   :  { %v1258_v60 = vrot.slane %v1257_v51, 1  ;;  %v1265_v63 = vadd.f32 %v1264_v61, %v1263_v56  ;;  %v1393_v56 = vld [vmem:[%s2556_s11] sm:$0x1] }
 0x271   :  { %v1259_v2 = vadd.f32 %v1258_v60, %v1257_v51  ;;  %v1266_v3 = vrot.slane %v1265_v63, 1  ;;  %v1406_v51 = vld [vmem:[#allocation16] sm:$0x1] }
 0x273   :  { %v1260_v4 = vmul.f32 0.125, %v1259_v2  ;;  %v1267_v5 = vadd.f32 %v1266_v3, %v1265_v63 }
 0x275   :  { %v1268_v62 = vmul.f32 0.125, %v1267_v5  ;;  %v1269_v8 = vmul.f32 %v1260_v4, %v1260_v4 }
 0x277   :  { %v1270_v44 = vsub.f32 %v1268_v62, %v1269_v8  ;;  %v1981_v62 = vld [vmem:[#allocation2] ss:$0 sm:$0xff] }
 0x279   :  { %v1271_v10 = vmax.f32 %v1270_v44, 0.0 }
 0x27b   :  { %v1273_v11 = vadd.f32 1e-05, %v1271_v10 }
 0x27d   :  { %1994 = vrsqrt.f32 %v1273_v11  ;;  %vm1280_vm7 = vweird.f32 %v1273_v11 }
 0x283   :  { %v1995_v59 = vpop.eup %1994 }
 0x284   :  { %v1275_v12 = vmul.f32 %v1995_v59, %v1273_v11  ;;  %vm1281_vm6 = vweird.f32 %v1995_v59 }
 0x285   :  { %vm1282_vm8 = vmor %vm1280_vm7, %vm1281_vm6 }
 0x286   :  { %v1276_v13 = vmul.f32 %v1995_v59, %v1275_v12 }
 0x288   :  { %v1277_v15 = vmul.f32 0.5, %v1276_v13 }
 0x28a   :  { %v1278_v17 = vsub.f32 1.5, %v1277_v15 }
 0x28c   :  { %v1279_v21 = vmul.f32 %v1995_v59, %v1278_v17 }
 0x28e   :  { %v1283_v22 = vsel %vm1282_vm8, %v1995_v59, %v1279_v21 }
 0x28f   :  { %v1284_v18 = vmul.f32 %v1283_v22, %v1272_v20 }
 0x291   :  { %v1289_v24 = vperm.slane %v1284_v18, 0  ;;  %v1286_v27 = vmul.f32 %v1284_v18, %v1260_v4  ;;  %v1980_v4 = vld [vmem:[%s2558_s13] ss:$0 sm:$0xff] }
 0x293   :  { %v1287_v28 = vsub.f32 %v1285_v23, %v1286_v27  ;;  %v1291_v29 = vmul.f32 %v1289_v24, %v1251_v37 }
 0x295   :  { %v1293_v32 = vperm.slane %v1287_v28, 0 }
 0x297   :  { %v1295_v49 = vadd.f32 %v1293_v32, %v1291_v29 }
 0x299   :  { %v1296_v33 = vmax.f32 %v1295_v49, 0.0 }
 0x29b   :  { %v1297_v34 = vpack.c.bf16 %v1296_v33, %v1296_v33 }
 0x29d   :  { %1370 = vmatmul.bf16.vlgmr.msrb.gmra.mxu2 %v1297_v34 }
 0x320   :  { %v1371_v35 = vpop.f32.mrf.mxu2 }
 0x321   :  { %v1375_v38 = vrot.slane %v1371_v35, 4  ;;  %v1382_v14 = vmul.f32 %v1371_v35, %v1371_v35 }
 0x323   :  { %v1376_v39 = vadd.f32 %v1375_v38, %v1371_v35  ;;  %v1383_v40 = vrot.slane %v1382_v14, 4 }
 0x325   :  { %v1377_v6 = vrot.slane %v1376_v39, 2  ;;  %v1384_v41 = vadd.f32 %v1383_v40, %v1382_v14 }
 0x327   :  { %v1378_v25 = vadd.f32 %v1377_v6, %v1376_v39  ;;  %v1385_v31 = vrot.slane %v1384_v41, 2 }
 0x328   :  { %v1373_v42 = vpop.f32.mrf.mxu2 }
 0x329   :  { %v1379_v43 = vrot.slane %v1378_v25, 1  ;;  %v1386_v45 = vadd.f32 %v1385_v31, %v1384_v41 }
 0x32b   :  { %v1387_v0 = vrot.slane %v1386_v45, 1  ;;  %v1380_v46 = vadd.f32 %v1379_v43, %v1378_v25 }
 0x32d   :  { %v1388_v47 = vadd.f32 %v1387_v0, %v1386_v45  ;;  %v1381_v26 = vmul.f32 0.125, %v1380_v46 }
 0x32f   :  { %v1389_v48 = vmul.f32 0.125, %v1388_v47  ;;  %v1390_v16 = vmul.f32 %v1381_v26, %v1381_v26 }
 0x331   :  { %v1391_v50 = vsub.f32 %v1389_v48, %v1390_v16 }
 0x333   :  { %v1392_v37 = vmax.f32 %v1391_v50, 0.0 }
 0x335   :  { %v1394_v36 = vadd.f32 1e-05, %v1392_v37 }
 0x337   :  { %1996 = vrsqrt.f32 %v1394_v36  ;;  %vm1401_vm10 = vweird.f32 %v1394_v36 }
 0x33d   :  { %v1997_v52 = vpop.eup %1996 }
 0x33e   :  { %v1396_v53 = vmul.f32 %v1997_v52, %v1394_v36  ;;  %vm1402_vm9 = vweird.f32 %v1997_v52 }
 0x33f   :  { %vm1403_vm11 = vmor %vm1401_vm10, %vm1402_vm9 }
 0x340   :  { %v1397_v30 = vmul.f32 %v1997_v52, %v1396_v53 }
 0x342   :  { %v1398_v54 = vmul.f32 0.5, %v1397_v30 }
 0x344   :  { %v1399_v55 = vsub.f32 1.5, %v1398_v54 }
 0x346   :  { %v1400_v19 = vmul.f32 %v1997_v52, %v1399_v55 }
 0x348   :  { %v1404_v57 = vsel %vm1403_vm11, %v1997_v52, %v1400_v19 }
 0x349   :  { %v1405_v58 = vmul.f32 %v1404_v57, %v1393_v56 }
 0x34b   :  { %v1407_v61 = vmul.f32 %v1405_v58, %v1381_v26  ;;  %v1410_v60 = vperm.slane %v1405_v58, 0 }
 0x34d   :  { %v1408_v63 = vsub.f32 %v1406_v51, %v1407_v61  ;;  %v1412_v1 = vmul.f32 %v1410_v60, %v1371_v35 }
 0x34f   :  { %v1414_v2 = vperm.slane %v1408_v63, 0 }
 0x351   :  { %v1416_v3 = vadd.f32 %v1414_v2, %v1412_v1 }
 0x353   :  { %v1417_v5 = vmax.f32 %v1416_v3, 0.0 }
 0x355   :  { %v1422_v7 = vmul.f32 %v1980_v4, %v1417_v5 }
 0x357   :  { %1423 = vadd.xlane.f32.xlu0 %v1422_v7 }
 0x3ca   :  { %v1424_v8 = vpop.xlane.xlu0 %1423 }
 0x3cb   :  { %v1429_v9 = vadd.f32 %v1981_v62, %v1424_v8 }
 0x3cd   :  { %1431 = vst.msk [vmem:[%s2560_s15] sm:$0xff] %vm1430_vm12, %v1429_v9 }
 0x3ce   :  { %1436 = vsyncpa [#allocation4], 1 }
 0x3cf   :  { %1437 = vsyncpa [#allocation6], 1 }
 0x3d0   :  { %1438 = vsyncpa [#allocation9], 1 }
 0x3d1   :  { %1439 = vsyncpa [#allocation12], 1 }
 0x3d2   :  { %1440 = vsyncpa [#allocation15], 1 }

</bundles_post_ra>
